<compile_context>
chip_gen: v6e
topology: v6e:2x2x1
jax: 0.10.0
libtpu: 0.0.40
codegen_flags: <defaults>
</compile_context>

<pallas_src>
import jax
import jax.numpy as jnp
from jax.experimental import pallas as pl
from jax.experimental.pallas import tpu as pltpu

KH, KW = 2, 3  # 'vertical' conv with k=3


def res_conv_block_kernel(x_ref, w1_ref, b1_ref, w2_ref, b2_ref, o_ref, pad1, pad2):
    # Block shapes:
    #   x_ref : (Nb, H, W, Cin)           f32
    #   w1_ref: (KH*KW*2*Cin,  Cout)      bf16    b1_ref: (1, Cout)    f32
    #   w2_ref: (KH*KW*2*Cout, 2*Cout)    bf16    b2_ref: (1, 2*Cout)  f32
    #   o_ref : (Nb, H, W, Cout)          f32
    # Scratch (zero-padded concatenated-CELU buffers; pad top=1, left=1, right=1, bottom=0):
    #   pad1: (Nb, H+1, W+2, 2*Cin) f32   pad2: (Nb, H+1, W+2, 2*Cout) f32
    Nb, H, W, Cin = x_ref.shape
    Cout = o_ref.shape[-1]
    M = Nb * H * W

    def celu_halves(t):
        # concat([elu(t), elu(-t)], channel): single EUP exp, exp(-t) via approx reciprocal.
        e = jnp.exp(t)
        pos = jnp.where(t > 0, t, e - 1.0)
        neg = jnp.where(t < 0, -t, pl.reciprocal(e, approx=True) - 1.0)
        return jnp.concatenate([pos, neg], axis=-1)

    def fill_padded(pad_ref, val, c2):
        # Zero only the border; the (H, W) interior is fully overwritten every grid step.
        # (Parallel-safe: no state carried across grid iterations.)
        pad_ref[:, 0:1, :, :] = jnp.zeros((Nb, 1, W + 2, c2), jnp.float32)
        pad_ref[:, :, 0:1, :] = jnp.zeros((Nb, H + 1, 1, c2), jnp.float32)
        pad_ref[:, :, W + 1:W + 2, :] = jnp.zeros((Nb, H + 1, 1, c2), jnp.float32)
        pad_ref[:, 1:, 1:W + 1, :] = val

    def im2col(pad_ref, c2):
        # (M, KH*KW*c2) bf16 patch matrix -> a single MXU GEMM per stage.
        cols = []
        for kh in range(KH):
            for kw in range(KW):
                cols.append(pad_ref[:, kh:kh + H, kw:kw + W, :].reshape(M, c2))
        return jnp.concatenate(cols, axis=-1).astype(jnp.bfloat16)

    x = x_ref[...]  # (Nb, H, W, Cin)

    # ---- stage 1: conv1( CELU(x) ) : one GEMM, K = KH*KW*2*Cin ----
    fill_padded(pad1, celu_halves(x), 2 * Cin)
    h1 = jnp.dot(im2col(pad1, 2 * Cin), w1_ref[...],
                 preferred_element_type=jnp.float32) + b1_ref[...]        # (M, Cout)

    # ---- stage 2: conv2( CELU(h1) ) : one GEMM, K = KH*KW*2*Cout ----
    # TODO(synk): nn.Dropout(0.5) has no deterministic kernel equivalent; eval-mode identity used.
    fill_padded(pad2, celu_halves(h1.reshape(Nb, H, W, Cout)), 2 * Cout)
    h2 = jnp.dot(im2col(pad2, 2 * Cout), w2_ref[...],
                 preferred_element_type=jnp.float32) + b2_ref[...]        # (M, 2*Cout)

    # ---- gated activation + residual (stride == 1) ----
    gated = h2[:, :Cout] * jax.nn.sigmoid(h2[:, Cout:])
    o_ref[...] = (gated.reshape(Nb, H, W, Cout) + x).astype(o_ref.dtype)


def res_conv_block(x_nchw, w1, b1, w2, b2):
    """x_nchw: (N, Cin, H, W); w1: (Cout, 2*Cin, 2, 3); w2: (2*Cout, 2*Cout, 2, 3)."""
    N, Cin, H, W = x_nchw.shape
    Cout = w1.shape[0]
    assert Cin == Cout, "stride=1 residual path requires in_ch == out_ch"
    assert w1.shape == (Cout, 2 * Cin, KH, KW)
    assert w2.shape == (2 * Cout, 2 * Cout, KH, KW)

    # Pack several images per grid step so the GEMM M dim approaches an MXU tile (>=256)
    # when the batch allows it.
    HW = H * W
    Nb = N
    for cand in range(1, N + 1):
        if N % cand == 0 and cand * HW >= 256:
            Nb = cand
            break

    x = jnp.transpose(x_nchw, (0, 2, 3, 1)).astype(jnp.float32)           # NCHW -> NHWC
    # (Cout, 2Cin, KH, KW) -> (KH, KW, 2Cin, Cout) -> flat (KH*KW*2Cin, Cout), bf16 for the MXU.
    w1k = jnp.transpose(w1, (2, 3, 1, 0)).reshape(KH * KW * 2 * Cin, Cout).astype(jnp.bfloat16)
    w2k = jnp.transpose(w2, (2, 3, 1, 0)).reshape(KH * KW * 2 * Cout, 2 * Cout).astype(jnp.bfloat16)
    b1k = b1.reshape(1, Cout).astype(jnp.float32)
    b2k = b2.reshape(1, 2 * Cout).astype(jnp.float32)

    out = pl.pallas_call(
        res_conv_block_kernel,
        out_shape=jax.ShapeDtypeStruct((N, H, W, Cout), jnp.float32),
        grid_spec=pltpu.PrefetchScalarGridSpec(
            num_scalar_prefetch=0,
            grid=(N // Nb,),
            in_specs=[
                pl.BlockSpec((Nb, H, W, Cin), lambda n: (n, 0, 0, 0)),
                pl.BlockSpec((KH * KW * 2 * Cin, Cout), lambda n: (0, 0)),
                pl.BlockSpec((1, Cout), lambda n: (0, 0)),
                pl.BlockSpec((KH * KW * 2 * Cout, 2 * Cout), lambda n: (0, 0)),
                pl.BlockSpec((1, 2 * Cout), lambda n: (0, 0)),
            ],
            out_specs=pl.BlockSpec((Nb, H, W, Cout), lambda n: (n, 0, 0, 0)),
            scratch_shapes=[
                pltpu.VMEM((Nb, H + 1, W + 2, 2 * Cin), jnp.float32),
                pltpu.VMEM((Nb, H + 1, W + 2, 2 * Cout), jnp.float32),
            ],
        ),
        # "parallel": lets v7x shard the batch axis across its 2 TensorCores; neutral on v5e/v6e.
        compiler_params=pltpu.CompilerParams(dimension_semantics=("parallel",)),
    )(x, w1k, b1k, w2k, b2k)

    return jnp.transpose(out, (0, 3, 1, 2))                                # NHWC -> NCHW


# ---------- pure-JAX reference (for correctness check) ----------
def ref_forward_nchw(x_nchw, w1, b1, w2, b2):
    x = jnp.transpose(x_nchw, (0, 2, 3, 1))

    def celu(t):
        u = jnp.concatenate([t, -t], axis=-1)
        return jnp.where(u > 0, u, jnp.exp(u) - 1.0)

    def conv(t, w, b):
        w_hwio = jnp.transpose(w, (2, 3, 1, 0))
        y = jax.lax.conv_general_dilated(
            t, w_hwio, window_strides=(1, 1),
            padding=((1, 0), (1, 1)),
            dimension_numbers=('NHWC', 'HWIO', 'NHWC'))
        return y + b

    h1 = conv(celu(x), w1, b1)
    h2 = conv(celu(h1), w2, b2)
    Cout = h1.shape[-1]
    out = h2[..., :Cout] * jax.nn.sigmoid(h2[..., Cout:]) + x
    return jnp.transpose(out, (0, 3, 1, 2))


def wn_conv_params(key, cout, cin, kh, kw):
    """Deterministic weight-norm conv params: w = g * v / ||v|| (norm over in,kh,kw)."""
    kv, kg, kb = jax.random.split(key, 3)
    v = jax.random.normal(kv, (cout, cin, kh, kw), jnp.float32) * 0.1
    g = jax.random.uniform(kg, (cout,), jnp.float32, minval=0.5, maxval=1.5)
    b = jax.random.normal(kb, (cout,), jnp.float32) * 0.1
    norm = jnp.sqrt(jnp.sum(v * v, axis=(1, 2, 3), keepdims=True))
    w = (g[:, None, None, None] * v) / norm
    return w, b


if __name__ == "__main__":
    key = jax.random.PRNGKey(0)
    kx, k1, k2 = jax.random.split(key, 3)

    # small shapes consistent with the module (in_ch == out_ch so the residual works)
    N, C, H, W = 2, 32, 8, 8
    x = jax.random.normal(kx, (N, C, H, W), jnp.float32)          # NCHW, like PyTorch

    w1, b1 = wn_conv_params(k1, C, 2 * C, KH, KW)                 # conv1: 2*in_ch -> out_ch
    w2, b2 = wn_conv_params(k2, 2 * C, 2 * C, KH, KW)             # conv2: 2*out_ch -> 2*out_ch

    out = res_conv_block(x, w1, b1, w2, b2)
    out = jax.block_until_ready(out)

    ref = ref_forward_nchw(x, w1, b1, w2, b2)
    assert out.shape == (N, C, H, W)
    assert bool(jnp.allclose(out, ref, atol=5e-2, rtol=5e-2)), (
        f"max abs diff = {float(jnp.max(jnp.abs(out - ref)))}")

    print("KERNEL_OK")
</pallas_src>

<mosaic_0001>
module attributes {stable_mosaic.version = 11 : i64} {
  func.func @res_conv_block_kernel(%arg0: i32, %arg1: memref<2x8x8x32xf32, #tpu.memory_space<vmem>>, %arg2: memref<384x32xbf16, #tpu.memory_space<vmem>>, %arg3: memref<1x32xf32, #tpu.memory_space<vmem>>, %arg4: memref<384x64xbf16, #tpu.memory_space<vmem>>, %arg5: memref<1x64xf32, #tpu.memory_space<vmem>>, %arg6: memref<2x8x8x32xf32, #tpu.memory_space<vmem>>, %arg7: memref<2x9x10x64xf32, #tpu.memory_space<vmem>>, %arg8: memref<2x9x10x64xf32, #tpu.memory_space<vmem>>) attributes {dimension_semantics = [#tpu.dimension_semantics<parallel>], iteration_bounds = array<i64: 1>, scalar_prefetch = 0 : i64, scratch_operands = 2 : i64, tpu.core_type = #tpu.core_type<tc>, window_params = [{transform_indices = @transform_0, window_bounds = array<i64: 2, 8, 8, 32>}, {pipeline_mode = #tpu.pipeline_mode<synchronous>, transform_indices = @transform_1, window_bounds = array<i64: 384, 32>}, {pipeline_mode = #tpu.pipeline_mode<synchronous>, transform_indices = @transform_2, window_bounds = array<i64: 1, 32>}, {pipeline_mode = #tpu.pipeline_mode<synchronous>, transform_indices = @transform_3, window_bounds = array<i64: 384, 64>}, {pipeline_mode = #tpu.pipeline_mode<synchronous>, transform_indices = @transform_4, window_bounds = array<i64: 1, 64>}, {transform_indices = @transform_5, window_bounds = array<i64: 2, 8, 8, 32>}]} {
    %c0 = arith.constant 0 : index
    %c0_0 = arith.constant 0 : index
    %c0_1 = arith.constant 0 : index
    %c0_2 = arith.constant 0 : index
    %0 = vector.load %arg1[%c0, %c0_0, %c0_1, %c0_2] : memref<2x8x8x32xf32, #tpu.memory_space<vmem>>, vector<2x8x8x32xf32>
    %1 = math.exp %0 : vector<2x8x8x32xf32>
    %cst = arith.constant 0.000000e+00 : f32
    %2 = vector.broadcast %cst : f32 to vector<2x8x8x32xf32>
    %3 = arith.cmpf ogt, %0, %2 : vector<2x8x8x32xf32>
    %cst_3 = arith.constant 1.000000e+00 : f32
    %4 = vector.broadcast %cst_3 : f32 to vector<2x8x8x32xf32>
    %5 = arith.subf %1, %4 : vector<2x8x8x32xf32>
    %6 = arith.select %3, %0, %5 : vector<2x8x8x32xi1>, vector<2x8x8x32xf32>
    %cst_4 = arith.constant 0.000000e+00 : f32
    %7 = vector.broadcast %cst_4 : f32 to vector<2x8x8x32xf32>
    %8 = arith.cmpf olt, %0, %7 : vector<2x8x8x32xf32>
    %cst_5 = arith.constant 0.000000e+00 : f32
    %9 = vector.broadcast %cst_5 : f32 to vector<2x8x8x32xf32>
    %10 = arith.subf %9, %0 : vector<2x8x8x32xf32>
    %11 = tpu.reciprocal %1 {approx = true} : vector<2x8x8x32xf32> -> vector<2x8x8x32xf32>
    %cst_6 = arith.constant 1.000000e+00 : f32
    %12 = vector.broadcast %cst_6 : f32 to vector<2x8x8x32xf32>
    %13 = arith.subf %11, %12 : vector<2x8x8x32xf32>
    %14 = arith.select %8, %10, %13 : vector<2x8x8x32xi1>, vector<2x8x8x32xf32>
    %15 = tpu.concatenate %6, %14 in 3 : vector<2x8x8x32xf32>, vector<2x8x8x32xf32> -> vector<2x8x8x64xf32>
    %cst_7 = arith.constant 0.000000e+00 : f32
    %16 = vector.broadcast %cst_7 : f32 to vector<2x1x10x64xf32>
    %c0_8 = arith.constant 0 : index
    %c0_9 = arith.constant 0 : index
    %c0_10 = arith.constant 0 : index
    %c0_11 = arith.constant 0 : index
    %17 = vector.load %arg7[%c0_8, %c0_9, %c0_10, %c0_11] : memref<2x9x10x64xf32, #tpu.memory_space<vmem>>, vector<2x1x10x64xf32>
    tpu.vector_store %arg7[%c0_8, %c0_9, %c0_10, %c0_11], %16 {strides = array<i32>} : memref<2x9x10x64xf32, #tpu.memory_space<vmem>>, vector<2x1x10x64xf32>,
    %cst_12 = arith.constant 0.000000e+00 : f32
    %18 = vector.broadcast %cst_12 : f32 to vector<2x9x1x64xf32>
    %c0_13 = arith.constant 0 : index
    %c0_14 = arith.constant 0 : index
    %c0_15 = arith.constant 0 : index
    %c0_16 = arith.constant 0 : index
    %19 = vector.load %arg7[%c0_13, %c0_14, %c0_15, %c0_16] : memref<2x9x10x64xf32, #tpu.memory_space<vmem>>, vector<2x9x1x64xf32>
    tpu.vector_store %arg7[%c0_13, %c0_14, %c0_15, %c0_16], %18 {strides = array<i32>} : memref<2x9x10x64xf32, #tpu.memory_space<vmem>>, vector<2x9x1x64xf32>,
    %cst_17 = arith.constant 0.000000e+00 : f32
    %20 = vector.broadcast %cst_17 : f32 to vector<2x9x1x64xf32>
    %c0_18 = arith.constant 0 : index
    %c0_19 = arith.constant 0 : index
    %c9 = arith.constant 9 : index
    %c0_20 = arith.constant 0 : index
    %21 = vector.load %arg7[%c0_18, %c0_19, %c9, %c0_20] : memref<2x9x10x64xf32, #tpu.memory_space<vmem>>, vector<2x9x1x64xf32>
    tpu.vector_store %arg7[%c0_18, %c0_19, %c9, %c0_20], %20 {strides = array<i32>} : memref<2x9x10x64xf32, #tpu.memory_space<vmem>>, vector<2x9x1x64xf32>,
    %c0_21 = arith.constant 0 : index
    %c1 = arith.constant 1 : index
    %c1_22 = arith.constant 1 : index
    %c0_23 = arith.constant 0 : index
    %22 = vector.load %arg7[%c0_21, %c1, %c1_22, %c0_23] : memref<2x9x10x64xf32, #tpu.memory_space<vmem>>, vector<2x8x8x64xf32>
    tpu.vector_store %arg7[%c0_21, %c1, %c1_22, %c0_23], %15 {strides = array<i32>} : memref<2x9x10x64xf32, #tpu.memory_space<vmem>>, vector<2x8x8x64xf32>,
    %c0_24 = arith.constant 0 : index
    %c0_25 = arith.constant 0 : index
    %c0_26 = arith.constant 0 : index
    %c0_27 = arith.constant 0 : index
    %23 = vector.load %arg7[%c0_24, %c0_25, %c0_26, %c0_27] : memref<2x9x10x64xf32, #tpu.memory_space<vmem>>, vector<2x8x8x64xf32>
    %24 = vector.shape_cast %23 : vector<2x8x8x64xf32> to vector<128x64xf32>
    %c0_28 = arith.constant 0 : index
    %c0_29 = arith.constant 0 : index
    %c1_30 = arith.constant 1 : index
    %c0_31 = arith.constant 0 : index
    %25 = vector.load %arg7[%c0_28, %c0_29, %c1_30, %c0_31] : memref<2x9x10x64xf32, #tpu.memory_space<vmem>>, vector<2x8x8x64xf32>
    %26 = vector.shape_cast %25 : vector<2x8x8x64xf32> to vector<128x64xf32>
    %c0_32 = arith.constant 0 : index
    %c0_33 = arith.constant 0 : index
    %c2 = arith.constant 2 : index
    %c0_34 = arith.constant 0 : index
    %27 = vector.load %arg7[%c0_32, %c0_33, %c2, %c0_34] : memref<2x9x10x64xf32, #tpu.memory_space<vmem>>, vector<2x8x8x64xf32>
    %28 = vector.shape_cast %27 : vector<2x8x8x64xf32> to vector<128x64xf32>
    %c0_35 = arith.constant 0 : index
    %c1_36 = arith.constant 1 : index
    %c0_37 = arith.constant 0 : index
    %c0_38 = arith.constant 0 : index
    %29 = vector.load %arg7[%c0_35, %c1_36, %c0_37, %c0_38] : memref<2x9x10x64xf32, #tpu.memory_space<vmem>>, vector<2x8x8x64xf32>
    %30 = vector.shape_cast %29 : vector<2x8x8x64xf32> to vector<128x64xf32>
    %c0_39 = arith.constant 0 : index
    %c1_40 = arith.constant 1 : index
    %c1_41 = arith.constant 1 : index
    %c0_42 = arith.constant 0 : index
    %31 = vector.load %arg7[%c0_39, %c1_40, %c1_41, %c0_42] : memref<2x9x10x64xf32, #tpu.memory_space<vmem>>, vector<2x8x8x64xf32>
    %32 = vector.shape_cast %31 : vector<2x8x8x64xf32> to vector<128x64xf32>
    %c0_43 = arith.constant 0 : index
    %c1_44 = arith.constant 1 : index
    %c2_45 = arith.constant 2 : index
    %c0_46 = arith.constant 0 : index
    %33 = vector.load %arg7[%c0_43, %c1_44, %c2_45, %c0_46] : memref<2x9x10x64xf32, #tpu.memory_space<vmem>>, vector<2x8x8x64xf32>
    %34 = vector.shape_cast %33 : vector<2x8x8x64xf32> to vector<128x64xf32>
    %35 = tpu.concatenate %24, %26, %28, %30, %32, %34 in 1 : vector<128x64xf32>, vector<128x64xf32>, vector<128x64xf32>, vector<128x64xf32>, vector<128x64xf32>, vector<128x64xf32> -> vector<128x384xf32>
    %36 = arith.truncf %35 : vector<128x384xf32> to vector<128x384xbf16>
    %c0_47 = arith.constant 0 : index
    %c0_48 = arith.constant 0 : index
    %37 = vector.load %arg2[%c0_47, %c0_48] : memref<384x32xbf16, #tpu.memory_space<vmem>>, vector<384x32xbf16>
    %cst_49 = arith.constant dense<0.000000e+00> : vector<128x32xf32>
    %38 = tpu.matmul %36, %37, %cst_49 {dimension_numbers = #tpu.dot_dimension_numbers<[1], [0], [0], [1], [0, 0, 1, 1], [], []>} : vector<128x384xbf16>, vector<384x32xbf16>, vector<128x32xf32> -> vector<128x32xf32>
    %c0_50 = arith.constant 0 : index
    %c0_51 = arith.constant 0 : index
    %39 = vector.load %arg3[%c0_50, %c0_51] : memref<1x32xf32, #tpu.memory_space<vmem>>, vector<1x32xf32>
    %40 = vector.broadcast %39 : vector<1x32xf32> to vector<128x32xf32>
    %41 = arith.addf %38, %40 : vector<128x32xf32>
    %42 = vector.shape_cast %41 : vector<128x32xf32> to vector<2x8x8x32xf32>
    %43 = math.exp %42 : vector<2x8x8x32xf32>
    %cst_52 = arith.constant 0.000000e+00 : f32
    %44 = vector.broadcast %cst_52 : f32 to vector<2x8x8x32xf32>
    %45 = arith.cmpf ogt, %42, %44 : vector<2x8x8x32xf32>
    %cst_53 = arith.constant 1.000000e+00 : f32
    %46 = vector.broadcast %cst_53 : f32 to vector<2x8x8x32xf32>
    %47 = arith.subf %43, %46 : vector<2x8x8x32xf32>
    %48 = arith.select %45, %42, %47 : vector<2x8x8x32xi1>, vector<2x8x8x32xf32>
    %cst_54 = arith.constant 0.000000e+00 : f32
    %49 = vector.broadcast %cst_54 : f32 to vector<2x8x8x32xf32>
    %50 = arith.cmpf olt, %42, %49 : vector<2x8x8x32xf32>
    %cst_55 = arith.constant 0.000000e+00 : f32
    %51 = vector.broadcast %cst_55 : f32 to vector<2x8x8x32xf32>
    %52 = arith.subf %51, %42 : vector<2x8x8x32xf32>
    %53 = tpu.reciprocal %43 {approx = true} : vector<2x8x8x32xf32> -> vector<2x8x8x32xf32>
    %cst_56 = arith.constant 1.000000e+00 : f32
    %54 = vector.broadcast %cst_56 : f32 to vector<2x8x8x32xf32>
    %55 = arith.subf %53, %54 : vector<2x8x8x32xf32>
    %56 = arith.select %50, %52, %55 : vector<2x8x8x32xi1>, vector<2x8x8x32xf32>
    %57 = tpu.concatenate %48, %56 in 3 : vector<2x8x8x32xf32>, vector<2x8x8x32xf32> -> vector<2x8x8x64xf32>
    %cst_57 = arith.constant 0.000000e+00 : f32
    %58 = vector.broadcast %cst_57 : f32 to vector<2x1x10x64xf32>
    %c0_58 = arith.constant 0 : index
    %c0_59 = arith.constant 0 : index
    %c0_60 = arith.constant 0 : index
    %c0_61 = arith.constant 0 : index
    %59 = vector.load %arg8[%c0_58, %c0_59, %c0_60, %c0_61] : memref<2x9x10x64xf32, #tpu.memory_space<vmem>>, vector<2x1x10x64xf32>
    tpu.vector_store %arg8[%c0_58, %c0_59, %c0_60, %c0_61], %58 {strides = array<i32>} : memref<2x9x10x64xf32, #tpu.memory_space<vmem>>, vector<2x1x10x64xf32>,
    %cst_62 = arith.constant 0.000000e+00 : f32
    %60 = vector.broadcast %cst_62 : f32 to vector<2x9x1x64xf32>
    %c0_63 = arith.constant 0 : index
    %c0_64 = arith.constant 0 : index
    %c0_65 = arith.constant 0 : index
    %c0_66 = arith.constant 0 : index
    %61 = vector.load %arg8[%c0_63, %c0_64, %c0_65, %c0_66] : memref<2x9x10x64xf32, #tpu.memory_space<vmem>>, vector<2x9x1x64xf32>
    tpu.vector_store %arg8[%c0_63, %c0_64, %c0_65, %c0_66], %60 {strides = array<i32>} : memref<2x9x10x64xf32, #tpu.memory_space<vmem>>, vector<2x9x1x64xf32>,
    %cst_67 = arith.constant 0.000000e+00 : f32
    %62 = vector.broadcast %cst_67 : f32 to vector<2x9x1x64xf32>
    %c0_68 = arith.constant 0 : index
    %c0_69 = arith.constant 0 : index
    %c9_70 = arith.constant 9 : index
    %c0_71 = arith.constant 0 : index
    %63 = vector.load %arg8[%c0_68, %c0_69, %c9_70, %c0_71] : memref<2x9x10x64xf32, #tpu.memory_space<vmem>>, vector<2x9x1x64xf32>
    tpu.vector_store %arg8[%c0_68, %c0_69, %c9_70, %c0_71], %62 {strides = array<i32>} : memref<2x9x10x64xf32, #tpu.memory_space<vmem>>, vector<2x9x1x64xf32>,
    %c0_72 = arith.constant 0 : index
    %c1_73 = arith.constant 1 : index
    %c1_74 = arith.constant 1 : index
    %c0_75 = arith.constant 0 : index
    %64 = vector.load %arg8[%c0_72, %c1_73, %c1_74, %c0_75] : memref<2x9x10x64xf32, #tpu.memory_space<vmem>>, vector<2x8x8x64xf32>
    tpu.vector_store %arg8[%c0_72, %c1_73, %c1_74, %c0_75], %57 {strides = array<i32>} : memref<2x9x10x64xf32, #tpu.memory_space<vmem>>, vector<2x8x8x64xf32>,
    %c0_76 = arith.constant 0 : index
    %c0_77 = arith.constant 0 : index
    %c0_78 = arith.constant 0 : index
    %c0_79 = arith.constant 0 : index
    %65 = vector.load %arg8[%c0_76, %c0_77, %c0_78, %c0_79] : memref<2x9x10x64xf32, #tpu.memory_space<vmem>>, vector<2x8x8x64xf32>
    %66 = vector.shape_cast %65 : vector<2x8x8x64xf32> to vector<128x64xf32>
    %c0_80 = arith.constant 0 : index
    %c0_81 = arith.constant 0 : index
    %c1_82 = arith.constant 1 : index
    %c0_83 = arith.constant 0 : index
    %67 = vector.load %arg8[%c0_80, %c0_81, %c1_82, %c0_83] : memref<2x9x10x64xf32, #tpu.memory_space<vmem>>, vector<2x8x8x64xf32>
    %68 = vector.shape_cast %67 : vector<2x8x8x64xf32> to vector<128x64xf32>
    %c0_84 = arith.constant 0 : index
    %c0_85 = arith.constant 0 : index
    %c2_86 = arith.constant 2 : index
    %c0_87 = arith.constant 0 : index
    %69 = vector.load %arg8[%c0_84, %c0_85, %c2_86, %c0_87] : memref<2x9x10x64xf32, #tpu.memory_space<vmem>>, vector<2x8x8x64xf32>
    %70 = vector.shape_cast %69 : vector<2x8x8x64xf32> to vector<128x64xf32>
    %c0_88 = arith.constant 0 : index
    %c1_89 = arith.constant 1 : index
    %c0_90 = arith.constant 0 : index
    %c0_91 = arith.constant 0 : index
    %71 = vector.load %arg8[%c0_88, %c1_89, %c0_90, %c0_91] : memref<2x9x10x64xf32, #tpu.memory_space<vmem>>, vector<2x8x8x64xf32>
    %72 = vector.shape_cast %71 : vector<2x8x8x64xf32> to vector<128x64xf32>
    %c0_92 = arith.constant 0 : index
    %c1_93 = arith.constant 1 : index
    %c1_94 = arith.constant 1 : index
    %c0_95 = arith.constant 0 : index
    %73 = vector.load %arg8[%c0_92, %c1_93, %c1_94, %c0_95] : memref<2x9x10x64xf32, #tpu.memory_space<vmem>>, vector<2x8x8x64xf32>
    %74 = vector.shape_cast %73 : vector<2x8x8x64xf32> to vector<128x64xf32>
    %c0_96 = arith.constant 0 : index
    %c1_97 = arith.constant 1 : index
    %c2_98 = arith.constant 2 : index
    %c0_99 = arith.constant 0 : index
    %75 = vector.load %arg8[%c0_96, %c1_97, %c2_98, %c0_99] : memref<2x9x10x64xf32, #tpu.memory_space<vmem>>, vector<2x8x8x64xf32>
    %76 = vector.shape_cast %75 : vector<2x8x8x64xf32> to vector<128x64xf32>
    %77 = tpu.concatenate %66, %68, %70, %72, %74, %76 in 1 : vector<128x64xf32>, vector<128x64xf32>, vector<128x64xf32>, vector<128x64xf32>, vector<128x64xf32>, vector<128x64xf32> -> vector<128x384xf32>
    %78 = arith.truncf %77 : vector<128x384xf32> to vector<128x384xbf16>
    %c0_100 = arith.constant 0 : index
    %c0_101 = arith.constant 0 : index
    %79 = vector.load %arg4[%c0_100, %c0_101] : memref<384x64xbf16, #tpu.memory_space<vmem>>, vector<384x64xbf16>
    %cst_102 = arith.constant dense<0.000000e+00> : vector<128x64xf32>
    %80 = tpu.matmul %78, %79, %cst_102 {dimension_numbers = #tpu.dot_dimension_numbers<[1], [0], [0], [1], [0, 0, 1, 1], [], []>} : vector<128x384xbf16>, vector<384x64xbf16>, vector<128x64xf32> -> vector<128x64xf32>
    %c0_103 = arith.constant 0 : index
    %c0_104 = arith.constant 0 : index
    %81 = vector.load %arg5[%c0_103, %c0_104] : memref<1x64xf32, #tpu.memory_space<vmem>>, vector<1x64xf32>
    %82 = vector.broadcast %81 : vector<1x64xf32> to vector<128x64xf32>
    %83 = arith.addf %80, %82 : vector<128x64xf32>
    %84 = vector.extract_strided_slice %83 {offsets = [0, 0], sizes = [128, 32], strides = [1, 1]} : vector<128x64xf32> to vector<128x32xf32>
    %85 = vector.extract_strided_slice %83 {offsets = [0, 32], sizes = [128, 32], strides = [1, 1]} : vector<128x64xf32> to vector<128x32xf32>
    %86 = arith.negf %85 : vector<128x32xf32>
    %87 = math.exp %86 : vector<128x32xf32>
    %cst_105 = arith.constant 1.000000e+00 : f32
    %88 = vector.broadcast %cst_105 : f32 to vector<128x32xf32>
    %89 = arith.addf %88, %87 : vector<128x32xf32>
    %90 = arith.divf %88, %89 : vector<128x32xf32>
    %91 = arith.mulf %84, %90 : vector<128x32xf32>
    %92 = vector.shape_cast %91 : vector<128x32xf32> to vector<2x8x8x32xf32>
    %93 = arith.addf %92, %0 : vector<2x8x8x32xf32>
    %c0_106 = arith.constant 0 : index
    %c0_107 = arith.constant 0 : index
    %c0_108 = arith.constant 0 : index
    %c0_109 = arith.constant 0 : index
    %94 = vector.load %arg6[%c0_106, %c0_107, %c0_108, %c0_109] : memref<2x8x8x32xf32, #tpu.memory_space<vmem>>, vector<2x8x8x32xf32>
    tpu.vector_store %arg6[%c0_106, %c0_107, %c0_108, %c0_109], %93 {strides = array<i32>} : memref<2x8x8x32xf32, #tpu.memory_space<vmem>>, vector<2x8x8x32xf32>,
    return
  }
  func.func @transform_0(%arg0: i32) -> (i32, i32, i32, i32) {
    %c0_i32 = arith.constant 0 : i32
    %c0_i32_0 = arith.constant 0 : i32
    %c0_i32_1 = arith.constant 0 : i32
    %c0_i32_2 = arith.constant 0 : i32
    return %arg0, %c0_i32, %c0_i32_0, %c0_i32_1 : i32, i32, i32, i32
  }
  func.func @transform_1(%arg0: i32) -> (i32, i32) {
    %c0_i32 = arith.constant 0 : i32
    %c0_i32_0 = arith.constant 0 : i32
    %c0_i32_1 = arith.constant 0 : i32
    return %c0_i32, %c0_i32_0 : i32, i32
  }
  func.func @transform_2(%arg0: i32) -> (i32, i32) {
    %c0_i32 = arith.constant 0 : i32
    %c0_i32_0 = arith.constant 0 : i32
    %c0_i32_1 = arith.constant 0 : i32
    return %c0_i32, %c0_i32_0 : i32, i32
  }
  func.func @transform_3(%arg0: i32) -> (i32, i32) {
    %c0_i32 = arith.constant 0 : i32
    %c0_i32_0 = arith.constant 0 : i32
    %c0_i32_1 = arith.constant 0 : i32
    return %c0_i32, %c0_i32_0 : i32, i32
  }
  func.func @transform_4(%arg0: i32) -> (i32, i32) {
    %c0_i32 = arith.constant 0 : i32
    %c0_i32_0 = arith.constant 0 : i32
    %c0_i32_1 = arith.constant 0 : i32
    return %c0_i32, %c0_i32_0 : i32, i32
  }
  func.func @transform_5(%arg0: i32) -> (i32, i32, i32, i32) {
    %c0_i32 = arith.constant 0 : i32
    %c0_i32_0 = arith.constant 0 : i32
    %c0_i32_1 = arith.constant 0 : i32
    %c0_i32_2 = arith.constant 0 : i32
    return %arg0, %c0_i32, %c0_i32_0, %c0_i32_1 : i32, i32, i32, i32
  }
}

</mosaic_0001>

<bundles_post_ra>
// kernel: tpu_custom_call.1
= control target key start
LH: loop header
LB: loop body
LE: loop exit
PB: predicated region body
PF: predicated region fallthrough
CT: control target
= control target key end

     0   :  { %vm279_vm0 = vcmask 523264   ;;  %vm281_vm1 = vcmask 517120   ;;  %v3245_v39 = vmov 0.0   ;;  %vm285_vm3 = vcmask 516096   ;;  %s3246_s25 = smov 32   ;;  %s4773_s0 = inlined_call_operand.vmem [shape: f32[2,8,8,32], index: 0, kind: input, shape index: {}]   ;;  %s4774_s1 = inlined_call_operand.vmem [shape: bf16[384,32], index: 1, kind: input, shape index: {}]   ;;  %s4775_s2 = inlined_call_operand.vmem [shape: f32[1,32], index: 2, kind: input, shape index: {}]   ;;  %s4776_s3 = inlined_call_operand.vmem [shape: bf16[384,64], index: 3, kind: input, shape index: {}]   ;;  %s4777_s4 = inlined_call_operand.vmem [shape: f32[1,64], index: 4, kind: input, shape index: {}]   ;;  %s4778_s5 = inlined_call_operand.hbm [shape: f32[2,8,8,32], index: 5, kind: output, shape index: {}]  }
   0x1   :  { %v3285_v0 = vld [vmem:[%s4773_s0 + $0x10] sm:$0xff]  ;;  %v3290_v1 = vld [vmem:[%s4773_s0] sm:$0xff]  ;;  %v3295_v2 = vld [vmem:[%s4773_s0 + $0x18] sm:$0xff]  ;;  %280 = vst.msk [vmem:[#allocation2] sm:$0xff] %vm279_vm0, %v3245_v39 }
   0x2   :  { %v42_v3 = vmul.f32 1.442695, %v3285_v0  ;;  %v38_v4 = vmul.f32 1.442695, %v3290_v1  ;;  %v44_v5 = vmul.f32 1.442695, %v3295_v2 }
   0x3   :  { %v3303_v6 = vld [vmem:[%s4773_s0 + $0x8] sm:$0xff]  ;;  %v3309_v8 = vld [vmem:[%s4773_s0 + $0x20] sm:$0xff]  ;;  %v3320_v11 = vld [vmem:[%s4773_s0 + $0x38] sm:$0xff]  ;;  %vm120_vm2 = vcmp.lt.f32.partialorder %v3285_v0, 0.0  ;;  %v136_v37 = vsub.f32 0.0, %v3285_v0  ;;  %283 = vst.msk [vmem:[#allocation2 + $0x90] sm:$0xff] %vm279_vm0, %v3245_v39 }
   0x4   :  { %3015 = vpow2.f32 %v42_v3  ;;  %v40_v7 = vmul.f32 1.442695, %v3303_v6  ;;  %v3314_v9 = vld [vmem:[%s4773_s0 + $0x28] sm:$0xff]  ;;  %v46_v10 = vmul.f32 1.442695, %v3309_v8  ;;  %v3325_v12 = vld [vmem:[%s4773_s0 + $0x30] sm:$0xff] }
   0x5   :  { %3017 = vpow2.f32 %v38_v4  ;;  %v48_v13 = vmul.f32 1.442695, %v3314_v9  ;;  %v3331_v14 = vld [vmem:[%s4773_s0 + $0x48] sm:$0xff]  ;;  %v52_v15 = vmul.f32 1.442695, %v3320_v11  ;;  %v3337_v16 = vld [vmem:[%s4773_s0 + $0x40] sm:$0xff] }
   0x6   :  { %3019 = vpow2.f32 %v44_v5  ;;  %v50_v17 = vmul.f32 1.442695, %v3325_v12  ;;  %v3343_v18 = vld [vmem:[%s4773_s0 + $0x58] sm:$0xff]  ;;  %v56_v19 = vmul.f32 1.442695, %v3331_v14  ;;  %v3349_v20 = vld [vmem:[%s4773_s0 + $0x50] sm:$0xff] }
   0x7   :  { %3021 = vpow2.f32 %v40_v7  ;;  %v54_v21 = vmul.f32 1.442695, %v3337_v16  ;;  %v3355_v22 = vld [vmem:[%s4773_s0 + $0x68] sm:$0xff]  ;;  %v60_v23 = vmul.f32 1.442695, %v3343_v18  ;;  %v3361_v24 = vld [vmem:[%s4773_s0 + $0x60] sm:$0xff] }
   0x8   :  { %3023 = vpow2.f32 %v46_v10  ;;  %v58_v25 = vmul.f32 1.442695, %v3349_v20  ;;  %v64_v26 = vmul.f32 1.442695, %v3355_v22  ;;  %v62_v27 = vmul.f32 1.442695, %v3361_v24 }
   0x9   :  { %3025 = vpow2.f32 %v48_v13  ;;  %v3383_v33 = vld [vmem:[%s4773_s0 + $0x78] sm:$0xff]  ;;  %282 = vst.msk [vmem:[#allocation2 + $0x8] sm:$0x3] %vm281_vm1, %v3245_v39  ;;  %284 = vst.msk [vmem:[#allocation2 + $0x98] sm:$0x3] %vm281_vm1, %v3245_v39  ;;  %v3417_v41 = vld [vmem:[%s4773_s0 + $0x70] sm:$0xff] }
   0xa   :  { %3027 = vpow2.f32 %v52_v15  ;;  %v3397_v38 = vmul.f32 1.442695, %v3383_v33  ;;  %1332 = vst.msk [vmem:[#allocation3] sm:$0xff] %vm279_vm0, %v3245_v39  ;;  %1334 = vst.msk [vmem:[#allocation3 + $0x90] sm:$0xff] %vm279_vm0, %v3245_v39  ;;  %v66_v45 = vmul.f32 1.442695, %v3417_v41 }
   0xb   :  { %3029 = vpow2.f32 %v50_v17  ;;  %1333 = vst.msk [vmem:[#allocation3 + $0x8] sm:$0x3] %vm281_vm1, %v3245_v39  ;;  %1335 = vst.msk [vmem:[#allocation3 + $0x98] sm:$0x3] %vm281_vm1, %v3245_v39  ;;  %vm118_vm4 = vcmp.lt.f32.partialorder %v3290_v1, 0.0  ;;  %v134_v49 = vsub.f32 0.0, %v3290_v1 }
   0xc   :  { %3031 = vpow2.f32 %v56_v19  ;;  %287 = vst.msk [vmem:[#allocation2 + $0x10] sm:$0x1] %vm285_vm3, %v3245_v39  ;;  %288 = vst.msk [vmem:[#allocation2 + $0x20] sm:$0x1] %vm285_vm3, %v3245_v39  ;;  %vm121_vm5 = vcmp.lt.f32.partialorder %v3295_v2, 0.0  ;;  %v137_v52 = vsub.f32 0.0, %v3295_v2 }
   0xd   :  { %3033 = vpow2.f32 %v54_v21  ;;  %286 = vst.msk [vmem:[#allocation2] sm:$0x1] %vm285_vm3, %v3245_v39  ;;  %289 = vst.msk [vmem:[#allocation2 + $0x30] sm:$0x1] %vm285_vm3, %v3245_v39  ;;  %v135_v55 = vsub.f32 0.0, %v3303_v6  ;;  %vm119_vm6 = vcmp.lt.f32.partialorder %v3303_v6, 0.0 }
   0xe   :  { %3035 = vpow2.f32 %v60_v23  ;;  %290 = vst.msk [vmem:[#allocation2 + $0x40] sm:$0x1] %vm285_vm3, %v3245_v39  ;;  %291 = vst.msk [vmem:[#allocation2 + $0x50] sm:$0x1] %vm285_vm3, %v3245_v39  ;;  %v138_v62 = vsub.f32 0.0, %v3309_v8  ;;  %vm123_vm7 = vcmp.lt.f32.partialorder %v3314_v9, 0.0 }
   0xf   :  { %3037 = vpow2.f32 %v58_v25  ;;  %292 = vst.msk [vmem:[#allocation2 + $0x60] sm:$0x1] %vm285_vm3, %v3245_v39  ;;  %293 = vst.msk [vmem:[#allocation2 + $0x70] sm:$0x1] %vm285_vm3, %v3245_v39  ;;  %v139_v4 = vsub.f32 0.0, %v3314_v9  ;;  %vm122_vm8 = vcmp.lt.f32.partialorder %v3309_v8, 0.0 }
  0x10   :  { %3039 = vpow2.f32 %v64_v26  ;;  %294 = vst.msk [vmem:[#allocation2 + $0x80] sm:$0x1] %vm285_vm3, %v3245_v39  ;;  %295 = vst.msk [vmem:[#allocation2 + $0x90] sm:$0x1] %vm285_vm3, %v3245_v39  ;;  %vm125_vm9 = vcmp.lt.f32.partialorder %v3320_v11, 0.0  ;;  %v141_v19 = vsub.f32 0.0, %v3320_v11 }
  0x11   :  { %v3366_v28 = vpop.eup %3015  ;;  %3041 = vpow2.f32 %v62_v27  ;;  %296 = vst.msk [vmem:[#allocation2 + $0xa0] sm:$0x1] %vm285_vm3, %v3245_v39  ;;  %297 = vst.msk [vmem:[#allocation2 + $0xb0] sm:$0x1] %vm285_vm3, %v3245_v39  ;;  %vm124_vm10 = vcmp.lt.f32.partialorder %v3325_v12, 0.0  ;;  %vm127_vm11 = vcmp.lt.f32.partialorder %v3331_v14, 0.0 }
  0x12   :  { %v3368_v29 = vpop.eup %3017  ;;  %3043 = vrcp.f32 %v3366_v28  ;;  %298 = vst.msk [vmem:[#allocation2 + $0xc0] sm:$0x1] %vm285_vm3, %v3245_v39  ;;  %299 = vst.msk [vmem:[#allocation2 + $0xd0] sm:$0x1] %vm285_vm3, %v3245_v39  ;;  %vm126_vm12 = vcmp.lt.f32.partialorder %v3337_v16, 0.0  ;;  %vm129_vm13 = vcmp.lt.f32.partialorder %v3343_v18, 0.0 }
  0x13   :  { %v3371_v30 = vpop.eup %3019  ;;  %3045 = vrcp.f32 %v3368_v29  ;;  %300 = vst.msk [vmem:[#allocation2 + $0xe0] sm:$0x1] %vm285_vm3, %v3245_v39  ;;  %301 = vst.msk [vmem:[#allocation2 + $0xf0] sm:$0x1] %vm285_vm3, %v3245_v39  ;;  %vm128_vm14 = vcmp.lt.f32.partialorder %v3349_v20, 0.0  ;;  %vm131_vm15 = vcmp.lt.f32.partialorder %v3355_v22, 0.0 }
  0x14   :  { %v3374_v31 = vpop.eup %3021  ;;  %3047 = vrcp.f32 %v3371_v30  ;;  %302 = vst.msk [vmem:[#allocation2 + $0x100] sm:$0x1] %vm285_vm3, %v3245_v39  ;;  %303 = vst.msk [vmem:[#allocation2 + $0x110] sm:$0x1] %vm285_vm3, %v3245_v39  ;;  %vm130_vm1 = vcmp.lt.f32.partialorder %v3361_v24, 0.0 }
  0x15   :  { %v3377_v32 = vpop.eup %3023  ;;  %3049 = vrcp.f32 %v3374_v31  ;;  %304 = vst.msk [vmem:[#allocation2 + $0x9] sm:$0x1] %vm285_vm3, %v3245_v39  ;;  %305 = vst.msk [vmem:[#allocation2 + $0x19] sm:$0x1] %vm285_vm3, %v3245_v39 }
  0x16   :  { %v3385_v34 = vpop.eup %3025  ;;  %3051 = vrcp.f32 %v3377_v32  ;;  %306 = vst.msk [vmem:[#allocation2 + $0x29] sm:$0x1] %vm285_vm3, %v3245_v39  ;;  %307 = vst.msk [vmem:[#allocation2 + $0x39] sm:$0x1] %vm285_vm3, %v3245_v39 }
  0x17   :  { %v3388_v35 = vpop.eup %3027  ;;  %3053 = vrcp.f32 %v3385_v34  ;;  %308 = vst.msk [vmem:[#allocation2 + $0x49] sm:$0x1] %vm285_vm3, %v3245_v39  ;;  %309 = vst.msk [vmem:[#allocation2 + $0x59] sm:$0x1] %vm285_vm3, %v3245_v39 }
  0x18   :  { %v3391_v36 = vpop.eup %3029  ;;  %3055 = vrcp.f32 %v3388_v35  ;;  %310 = vst.msk [vmem:[#allocation2 + $0x69] sm:$0x1] %vm285_vm3, %v3245_v39  ;;  %311 = vst.msk [vmem:[#allocation2 + $0x79] sm:$0x1] %vm285_vm3, %v3245_v39 }
  0x19   :  { %v3411_v40 = vpop.eup %3031  ;;  %3057 = vrcp.f32 %v3391_v36  ;;  %312 = vst.msk [vmem:[#allocation2 + $0x89] sm:$0x1] %vm285_vm3, %v3245_v39  ;;  %313 = vst.msk [vmem:[#allocation2 + $0x99] sm:$0x1] %vm285_vm3, %v3245_v39 }
  0x1a   :  { %v3419_v42 = vpop.eup %3033  ;;  %3059 = vrcp.f32 %v3411_v40  ;;  %314 = vst.msk [vmem:[#allocation2 + $0xa9] sm:$0x1] %vm285_vm3, %v3245_v39  ;;  %315 = vst.msk [vmem:[#allocation2 + $0xb9] sm:$0x1] %vm285_vm3, %v3245_v39 }
  0x1b   :  { %316 = vst.msk [vmem:[#allocation2 + $0xc9] sm:$0x1] %vm285_vm3, %v3245_v39  ;;  %317 = vst.msk [vmem:[#allocation2 + $0xd9] sm:$0x1] %vm285_vm3, %v3245_v39  ;;  %v3566_v43 = vpop.eup %3035  ;;  %3061 = vrcp.f32 %v3419_v42 }
  0x1c   :  { %318 = vst.msk [vmem:[#allocation2 + $0xe9] sm:$0x1] %vm285_vm3, %v3245_v39  ;;  %319 = vst.msk [vmem:[#allocation2 + $0xf9] sm:$0x1] %vm285_vm3, %v3245_v39  ;;  %v3569_v44 = vpop.eup %3037  ;;  %3063 = vrcp.f32 %v3566_v43 }
  0x1d   :  { %320 = vst.msk [vmem:[#allocation2 + $0x109] sm:$0x1] %vm285_vm3, %v3245_v39  ;;  %321 = vst.msk [vmem:[#allocation2 + $0x119] sm:$0x1] %vm285_vm3, %v3245_v39  ;;  %v3573_v46 = vpop.eup %3039  ;;  %3065 = vrcp.f32 %v3569_v44 }
  0x1e   :  { %1336 = vst.msk [vmem:[#allocation3] sm:$0x1] %vm285_vm3, %v3245_v39  ;;  %1337 = vst.msk [vmem:[#allocation3 + $0x10] sm:$0x1] %vm285_vm3, %v3245_v39  ;;  %v3576_v47 = vpop.eup %3041  ;;  %3067 = vrcp.f32 %v3573_v46 }
  0x1f   :  { %1338 = vst.msk [vmem:[#allocation3 + $0x20] sm:$0x1] %vm285_vm3, %v3245_v39  ;;  %1339 = vst.msk [vmem:[#allocation3 + $0x30] sm:$0x1] %vm285_vm3, %v3245_v39  ;;  %v3044_v48 = vpop.eup %3043  ;;  %3069 = vrcp.f32 %v3576_v47 }
  0x20   :  { %1340 = vst.msk [vmem:[#allocation3 + $0x40] sm:$0x1] %vm285_vm3, %v3245_v39  ;;  %1341 = vst.msk [vmem:[#allocation3 + $0x50] sm:$0x1] %vm285_vm3, %v3245_v39  ;;  %v3046_v50 = vpop.eup %3045  ;;  %v2384_v51 = vadd.f32 -1.0, %v3044_v48  ;;  %3071 = vpow2.f32 %v3397_v38  ;;  %v142_v48 = vsub.f32 0.0, %v3337_v16 }
  0x21   :  { %1342 = vst.msk [vmem:[#allocation3 + $0x60] sm:$0x1] %vm285_vm3, %v3245_v39  ;;  %1343 = vst.msk [vmem:[#allocation3 + $0x70] sm:$0x1] %vm285_vm3, %v3245_v39  ;;  %v3048_v53 = vpop.eup %3047  ;;  %v2382_v54 = vadd.f32 -1.0, %v3046_v50  ;;  %3073 = vpow2.f32 %v66_v45  ;;  %v143_v45 = vsub.f32 0.0, %v3331_v14 }
  0x22   :  { %1344 = vst.msk [vmem:[#allocation3 + $0x80] sm:$0x1] %vm285_vm3, %v3245_v39  ;;  %1345 = vst.msk [vmem:[#allocation3 + $0x90] sm:$0x1] %vm285_vm3, %v3245_v39  ;;  %v3050_v56 = vpop.eup %3049  ;;  %v184_v57 = vsel %vm120_vm2, %v136_v37, %v2384_v51  ;;  %v2385_v58 = vadd.f32 -1.0, %v3048_v53  ;;  %v140_v37 = vsub.f32 0.0, %v3325_v12 }
  0x23   :  { %1346 = vst.msk [vmem:[#allocation3 + $0xa0] sm:$0x1] %vm285_vm3, %v3245_v39  ;;  %1347 = vst.msk [vmem:[#allocation3 + $0xb0] sm:$0x1] %vm285_vm3, %v3245_v39  ;;  %v3052_v59 = vpop.eup %3051  ;;  %218 = vrot.lane.b32.xlu1 %v184_v57, %s3246_s25  ;;  %v182_v60 = vsel %vm118_vm4, %v134_v49, %v2382_v54  ;;  %v2383_v61 = vadd.f32 -1.0, %v3050_v56  ;;  %v145_v50 = vsub.f32 0.0, %v3343_v18 }
  0x24   :  { %1348 = vst.msk [vmem:[#allocation3 + $0xc0] sm:$0x1] %vm285_vm3, %v3245_v39  ;;  %1349 = vst.msk [vmem:[#allocation3 + $0xd0] sm:$0x1] %vm285_vm3, %v3245_v39  ;;  %v3054_v63 = vpop.eup %3053  ;;  %214 = vrot.lane.b32.xlu0 %v182_v60, %s3246_s25  ;;  %v185_v3 = vsel %vm121_vm5, %v137_v52, %v2385_v58  ;;  %v2386_v10 = vadd.f32 -1.0, %v3052_v59  ;;  %v144_v51 = vsub.f32 0.0, %v3349_v20 }
  0x25   :  { %1350 = vst.msk [vmem:[#allocation3 + $0xe0] sm:$0x1] %vm285_vm3, %v3245_v39  ;;  %1351 = vst.msk [vmem:[#allocation3 + $0xf0] sm:$0x1] %vm285_vm3, %v3245_v39  ;;  %v3056_v5 = vpop.eup %3055  ;;  %v183_v7 = vsel %vm119_vm6, %v135_v55, %v2383_v61  ;;  %v2387_v13 = vadd.f32 -1.0, %v3054_v63  ;;  %v147_v55 = vsub.f32 0.0, %v3355_v22 }
  0x26   :  { %1352 = vst.msk [vmem:[#allocation3 + $0x100] sm:$0x1] %vm285_vm3, %v3245_v39  ;;  %1353 = vst.msk [vmem:[#allocation3 + $0x110] sm:$0x1] %vm285_vm3, %v3245_v39  ;;  %v3058_v15 = vpop.eup %3057  ;;  %v2389_v25 = vadd.f32 -1.0, %v3056_v5  ;;  %v186_v27 = vsel %vm122_vm8, %v138_v62, %v2386_v10  ;;  %v146_v59 = vsub.f32 0.0, %v3361_v24 }
  0x27   :  { %1354 = vst.msk [vmem:[#allocation3 + $0x9] sm:$0x1] %vm285_vm3, %v3245_v39  ;;  %1355 = vst.msk [vmem:[#allocation3 + $0x19] sm:$0x1] %vm285_vm3, %v3245_v39  ;;  %v3060_v17 = vpop.eup %3059  ;;  %220 = vrot.lane.b32.xlu1 %v185_v3, %s3246_s25  ;;  %v187_v23 = vsel %vm123_vm7, %v139_v4, %v2387_v13  ;;  %v2388_v38 = vadd.f32 -1.0, %v3058_v15 }
  0x28   :  { %1356 = vst.msk [vmem:[#allocation3 + $0x29] sm:$0x1] %vm285_vm3, %v3245_v39  ;;  %1357 = vst.msk [vmem:[#allocation3 + $0x39] sm:$0x1] %vm285_vm3, %v3245_v39  ;;  %v3062_v21 = vpop.eup %3061  ;;  %216 = vrot.lane.b32.xlu0 %v183_v7, %s3246_s25  ;;  %v189_v53 = vsel %vm125_vm9, %v141_v19, %v2389_v25  ;;  %v2391_v54 = vadd.f32 -1.0, %v3060_v17 }
  0x29   :  { %1358 = vst.msk [vmem:[#allocation3 + $0x49] sm:$0x1] %vm285_vm3, %v3245_v39  ;;  %1359 = vst.msk [vmem:[#allocation3 + $0x59] sm:$0x1] %vm285_vm3, %v3245_v39  ;;  %v3064_v26 = vpop.eup %3063  ;;  %v188_v57 = vsel %vm124_vm10, %v140_v37, %v2388_v38  ;;  %v2390_v58 = vadd.f32 -1.0, %v3062_v21 }
  0x2a   :  { %1360 = vst.msk [vmem:[#allocation3 + $0x69] sm:$0x1] %vm285_vm3, %v3245_v39  ;;  %1361 = vst.msk [vmem:[#allocation3 + $0x79] sm:$0x1] %vm285_vm3, %v3245_v39  ;;  %v2393_v61 = vadd.f32 -1.0, %v3064_v26  ;;  %v191_v4 = vsel %vm127_vm11, %v143_v45, %v2391_v54 }
  0x2b   :  { %1362 = vst.msk [vmem:[#allocation3 + $0x89] sm:$0x1] %vm285_vm3, %v3245_v39  ;;  %1363 = vst.msk [vmem:[#allocation3 + $0x99] sm:$0x1] %vm285_vm3, %v3245_v39  ;;  %224 = vrot.lane.b32.xlu1 %v187_v23, %s3246_s25  ;;  %v190_v5 = vsel %vm126_vm12, %v142_v48, %v2390_v58 }
  0x2c   :  { %1364 = vst.msk [vmem:[#allocation3 + $0xa9] sm:$0x1] %vm285_vm3, %v3245_v39  ;;  %1365 = vst.msk [vmem:[#allocation3 + $0xb9] sm:$0x1] %vm285_vm3, %v3245_v39  ;;  %222 = vrot.lane.b32.xlu0 %v186_v27, %s3246_s25  ;;  %v193_v7 = vsel %vm129_vm13, %v145_v50, %v2393_v61 }
  0x2d   :  { %1366 = vst.msk [vmem:[#allocation3 + $0xc9] sm:$0x1] %vm285_vm3, %v3245_v39  ;;  %1367 = vst.msk [vmem:[#allocation3 + $0xd9] sm:$0x1] %vm285_vm3, %v3245_v39 }
  0x2e   :  { %1368 = vst.msk [vmem:[#allocation3 + $0xe9] sm:$0x1] %vm285_vm3, %v3245_v39  ;;  %1369 = vst.msk [vmem:[#allocation3 + $0xf9] sm:$0x1] %vm285_vm3, %v3245_v39 }
  0x2f   :  { %1370 = vst.msk [vmem:[#allocation3 + $0x109] sm:$0x1] %vm285_vm3, %v3245_v39  ;;  %1371 = vst.msk [vmem:[#allocation3 + $0x119] sm:$0x1] %vm285_vm3, %v3245_v39  ;;  %v3066_v39 = vpop.eup %3065  ;;  %228 = vrot.lane.b32.xlu1 %v189_v53, %s3246_s25 }
  0x30   :  { %v3068_v49 = vpop.eup %3067  ;;  %v2392_v62 = vadd.f32 -1.0, %v3066_v39  ;;  %226 = vrot.lane.b32.xlu0 %v188_v57, %s3246_s25 }
  0x31   :  { %v3070_v52 = vpop.eup %3069  ;;  %v2395_v63 = vadd.f32 -1.0, %v3068_v49 }
  0x32   :  { %v3620_v56 = vpop.eup %3071  ;;  %v2394_v3 = vadd.f32 -1.0, %v3070_v52  ;;  %v192_v10 = vsel %vm128_vm14, %v144_v51, %v2392_v62 }
  0x33   :  { %v3626_v60 = vpop.eup %3073  ;;  %3075 = vrcp.f32 %v3620_v56  ;;  %232 = vrot.lane.b32.xlu1 %v191_v4, %s3246_s25  ;;  %v195_v13 = vsel %vm131_vm15, %v147_v55, %v2395_v63 }
  0x34   :  { %3077 = vrcp.f32 %v3626_v60  ;;  %230 = vrot.lane.b32.xlu0 %v190_v5, %s3246_s25  ;;  %v194_v15 = vsel %vm130_vm1, %v146_v59, %v2394_v3 }
  0x37   :  { %236 = vrot.lane.b32.xlu1 %v193_v7, %s3246_s25 }
  0x38   :  { %234 = vrot.lane.b32.xlu0 %v192_v10, %s3246_s25 }
  0x39   :  { %10 = vsyncpa [#allocation5], 0  ;;  %v149_v17 = vsub.f32 0.0, %v3383_v33  ;;  %vm133_vm2 = vcmp.lt.f32.partialorder %v3383_v33, 0.0  ;;  %v148_v21 = vsub.f32 0.0, %v3417_v41  ;;  %vm132_vm3 = vcmp.lt.f32.partialorder %v3417_v41, 0.0 }
  0x3a   :  { %v2967_v38 = vld [vmem:[%s4774_s1 + $0x78] sm:$0xff]   ;;  %v2969_v45 = vld [vmem:[%s4774_s1 + $0x70] sm:$0xff]   ;;  %v2972_v51 = vld [vmem:[%s4774_s1 + $0x68] sm:$0xff]   ;;  %v2368_v3 = vadd.f32 -1.0, %v3366_v28  ;;  %vm72_vm4 = vcmp.gt.f32.partialorder %v3285_v0, 0.0  ;;  %v2366_v4 = vadd.f32 -1.0, %v3368_v29 }
  0x3b   :  { %240 = vrot.lane.b32.xlu1 %v195_v13, %s3246_s25  ;;  %v2968_v39 = vld [vmem:[%s4774_s1 + $0x38] sm:$0xff]   ;;  %2496 = vmatprep.subr.bf16.mxu0 %v2967_v38  ;;  %v2973_v49 = vld [vmem:[%s4774_s1 + $0xb0] sm:$0xff]   ;;  %v2976_v52 = vld [vmem:[%s4774_s1 + $0xa8] sm:$0xff]   ;;  %vm70_vm5 = vcmp.gt.f32.partialorder %v3290_v1, 0.0  ;;  %v2369_v7 = vadd.f32 -1.0, %v3371_v30  ;;  %vm262_vm6 = vcmask 261120  }
  0x3c   :  { %238 = vrot.lane.b32.xlu0 %v194_v15, %s3246_s25  ;;  %v2970_v48 = vld [vmem:[%s4774_s1 + $0xb8] sm:$0xff]   ;;  %2497 = vmatpush3.bf16.msra.mxu0 %v2968_v39  ;;  %v2971_v50 = vld [vmem:[%s4774_s1 + $0x30] sm:$0xff]   ;;  %v2974_v53 = vld [vmem:[%s4774_s1 + $0x28] sm:$0xff]   ;;  %v104_v5 = vsel %vm72_vm4, %v3285_v0, %v2368_v3  ;;  %v102_v10 = vsel %vm70_vm5, %v3290_v1, %v2366_v4  ;;  %vm73_vm7 = vcmp.gt.f32.partialorder %v3295_v2, 0.0  ;;  %v2367_v13 = vadd.f32 -1.0, %v3374_v31  ;;  %s3249_s24 = smov [#allocation4]  }
  0x3d   :  { %2656 = vmatprep.subr.bf16.mxu1 %v2970_v48  ;;  %2498 = vmatprep.subr.bf16.mxu0 %v2969_v45  ;;  %v2975_v54 = vld [vmem:[%s4774_s1 + $0x60] sm:$0xff]   ;;  %v2978_v58 = vld [vmem:[%s4774_s1 + $0x58] sm:$0xff]   ;;  %v2981_v62 = vld [vmem:[%s4774_s1 + $0x50] sm:$0xff]   ;;  %vm71_vm8 = vcmp.gt.f32.partialorder %v3303_v6, 0.0  ;;  %vm75_vm9 = vcmp.gt.f32.partialorder %v3314_v9, 0.0  ;;  %vm74_vm10 = vcmp.gt.f32.partialorder %v3309_v8, 0.0 }
  0x3e   :  { %2657 = vmatpush3.bf16.msra.mxu1 %v2970_v48  ;;  %v2979_v55 = vld [vmem:[%s4774_s1 + $0xa0] sm:$0xff]   ;;  %v2982_v59 = vld [vmem:[%s4774_s1 + $0x98] sm:$0xff]   ;;  %v2983_v63 = vld [vmem:[%s4774_s1 + $0x10] sm:$0xff]   ;;  %v2373_v38 = vadd.f32 -1.0, %v3388_v35  ;;  %vm77_vm11 = vcmp.gt.f32.partialorder %v3320_v11, 0.0  ;;  %v2372_v45 = vadd.f32 -1.0, %v3391_v36 }
  0x3f   :  { %2658 = vmatprep.subr.bf16.mxu1 %v2973_v49  ;;  %v2977_v57 = vld [vmem:[%s4774_s1 + $0x20] sm:$0xff]   ;;  %v2980_v61 = vld [vmem:[%s4774_s1 + $0x18] sm:$0xff]   ;;  %v2984_v28 = vld [vmem:[%s4774_s1 + $0x48] sm:$0xff]   ;;  %vm76_vm12 = vcmp.gt.f32.partialorder %v3325_v12, 0.0  ;;  %vm79_vm13 = vcmp.gt.f32.partialorder %v3331_v14, 0.0  ;;  %vm78_vm14 = vcmp.gt.f32.partialorder %v3337_v16, 0.0 }
  0x40   :  { %v3076_v19 = vpop.eup %3075  ;;  %2499 = vmatpush3.bf16.msra.mxu0 %v2971_v50  ;;  %v2985_v0 = vld [vmem:[%s4774_s1 + $0x90] sm:$0xff]   ;;  %v2986_v29 = vld [vmem:[%s4774_s1 + $0x8] sm:$0xff]   ;;  %vm81_vm15 = vcmp.gt.f32.partialorder %v3343_v18, 0.0  ;;  %v2376_v4 = vadd.f32 -1.0, %v3569_v44  ;;  %vm80_vm1 = vcmp.gt.f32.partialorder %v3349_v20, 0.0  ;;  %vm85_vm4 = vcmp.gt.f32.partialorder %v3383_v33, 0.0 }
  0x41   :  { %v3078_v23 = vpop.eup %3077  ;;  %v2397_v25 = vadd.f32 -1.0, %v3076_v19  ;;  %2500 = vmatprep.subr.bf16.mxu0 %v2972_v51  ;;  %v2371_v19 = vadd.f32 -1.0, %v3385_v34  ;;  %v2988_v34 = vld [vmem:[%s4774_s1 + $0x88] sm:$0xff]   ;;  %v2375_v51 = vadd.f32 -1.0, %v3411_v40  ;;  %v2374_v40 = vadd.f32 -1.0, %v3419_v42  ;;  %s2355_s26 = sshll.u32 %s3249_s24, 4  ;;  %s2356_s26 = int_to_ptr.vmem [resolvable:$true] %s2355_s26 }
  0x42   :  { %v2396_v26 = vadd.f32 -1.0, %v3078_v23  ;;  %2659 = vmatpush3.bf16.msra.mxu1 %v2973_v49  ;;  %v2370_v23 = vadd.f32 -1.0, %v3377_v32  ;;  %v355_v49 = vld [vmem:[#allocation2 + $0x1] sm:$0xff]  ;;  %vm84_vm5 = vcmp.gt.f32.partialorder %v3417_v41, 0.0  ;;  %s3223_s28 = scalar_lea.vmem %s2356_s26, 2048  ;;  %p3228_p1 = scmp.lt.s32.totalorder %s2356_s26, %s2356_s26 }
  0x43   :  { %v197_v27 = vsel %vm133_vm2, %v149_v17, %v2397_v25  ;;  %2660 = vmatprep.subr.bf16.mxu1 %v2976_v52  ;;  %v105_v17 = vsel %vm73_vm7, %v3295_v2, %v2369_v7  ;;  %v2987_v2 = vld [vmem:[%s4774_s1 + $0x40] sm:$0xff]   ;;  %vm83_vm2 = vcmp.gt.f32.partialorder %v3355_v22, 0.0  ;;  %p3224_p0 = scmp.ne.s32.totalorder %s2356_s26, %s3223_s28  ;;  %p3229_p2 = scmp.lt.s32.totalorder %s3223_s28, %s3223_s28 }
  0x44   :  { %244 = vrot.lane.b32.xlu1 %v197_v27, %s3246_s25  ;;  %v196_v37 = vsel %vm132_vm3, %v148_v21, %v2396_v26  ;;  %2501 = vmatpush3.bf16.msra.mxu0 %v2974_v53  ;;  %v103_v21 = vsel %vm71_vm8, %v3303_v6, %v2367_v13  ;;  %v2989_v6 = vld [vmem:[%s4774_s1] sm:$0xff]   ;;  %v106_v39 = vsel %vm74_vm10, %v3309_v8, %v2370_v23  ;;  %vm82_vm3 = vcmp.gt.f32.partialorder %v3361_v24, 0.0 }
  0x45   :  { %242 = vrot.lane.b32.xlu0 %v196_v37, %s3246_s25  ;;  %2502 = vmatprep.subr.bf16.mxu0 %v2975_v54  ;;  %v107_v37 = vsel %vm75_vm9, %v3314_v9, %v2371_v19  ;;  %v2990_v9 = vld [vmem:[%s4774_s1 + $0x80] sm:$0xff]   ;;  %v108_v54 = vsel %vm76_vm12, %v3325_v12, %v2372_v45  ;;  %s3247_s1 = smov 64   ;;  %v2377_v12 = vadd.f32 -1.0, %v3566_v43  ;;  %v110_v43 = vsel %vm78_vm14, %v3337_v16, %v2374_v40  ;;  %p3230_p3 = por %p3229_p2, %p3228_p1 }
  0x46   :  { %2661 = vmatpush3.bf16.msra.mxu1 %v2976_v52  ;;  %v109_v52 = vsel %vm77_vm11, %v3320_v11, %v2373_v38  ;;  %v2380_v45 = vadd.f32 -1.0, %v3626_v60 }
  0x47   :  { %2662 = vmatprep.subr.bf16.mxu1 %v2979_v55  ;;  %p3231_p4 = pnand %p3230_p3, %p3224_p0 }
  0x48   :  { %2503 = vmatpush3.bf16.msra.mxu0 %v2977_v57 }
  0x49   :  { %2504 = vmatprep.subr.bf16.mxu0 %v2978_v58 }
  0x4a   :  { %2663 = vmatpush3.bf16.msra.mxu1 %v2979_v55 }
  0x4b   :  { %2664 = vmatprep.subr.bf16.mxu1 %v2982_v59 }
  0x4c   :  { %2505 = vmatpush3.bf16.msra.mxu0 %v2980_v61  ;;  %v111_v61 = vsel %vm79_vm13, %v3331_v14, %v2375_v51 }
  0x4d   :  { %2506 = vmatprep.subr.bf16.mxu0 %v2981_v62 }
  0x4e   :  { %2665 = vmatpush3.bf16.msra.mxu1 %v2982_v59 }
  0x4f   :  { %2666 = vmatprep.subr.bf16.mxu1 %v2985_v0 }
  0x50   :  { %2507 = vmatpush3.bf16.msra.mxu0 %v2983_v63 }
  0x51   :  { %2508 = vmatprep.subr.bf16.mxu0 %v2984_v28  ;;  %v113_v28 = vsel %vm81_vm15, %v3343_v18, %v2377_v12 }
  0x52   :  { %2667 = vmatpush3.bf16.msra.mxu1 %v2985_v0 }
  0x53   :  { %2668 = vmatprep.subr.bf16.mxu1 %v2988_v34 }
  0x54   :  { %2509 = vmatpush3.bf16.msra.mxu0 %v2986_v29  ;;  %v112_v29 = vsel %vm80_vm1, %v3349_v20, %v2376_v4 }
  0x55   :  { %2510 = vmatprep.subr.bf16.mxu0 %v2987_v2 }
  0x56   :  { %2669 = vmatpush3.bf16.msra.mxu1 %v2988_v34 }
  0x57   :  { %2670 = vmatprep.subr.bf16.mxu1 %v2990_v9 }
  0x58   :  { %2511 = vmatpush3.bf16.msra.mxu0 %v2989_v6 }
  0x5a   :  { %2671 = vmatpush3.bf16.msra.mxu1 %v2990_v9 }
  0x95   :  { %v219_v15 = vpop.permute.xlu1 %218 }
  0x96   :  { %v265_v1 = vsel %vm262_vm6, %v104_v5, %v219_v15  ;;  %v215_v30 = vpop.permute.xlu0 %214 }
  0x97   :  { %325 = vst.msk [vmem:[#allocation2 + $0x31] sm:$0xff] %vm279_vm0, %v265_v1  ;;  %v263_v31 = vsel %vm262_vm6, %v102_v10, %v215_v30  ;;  %v2379_v1 = vadd.f32 -1.0, %v3573_v46  ;;  %v2378_v30 = vadd.f32 -1.0, %v3576_v47 }
  0x98   :  { %323 = vst.msk [vmem:[#allocation2 + $0x11] sm:$0xff] %vm279_vm0, %v263_v31 }
  0x99   :  { %v221_v25 = vpop.permute.xlu1 %220 }
  0x9a   :  { %v266_v32 = vsel %vm262_vm6, %v105_v17, %v221_v25  ;;  %v217_v26 = vpop.permute.xlu0 %216 }
  0x9b   :  { %326 = vst.msk [vmem:[#allocation2 + $0x41] sm:$0xff] %vm279_vm0, %v266_v32  ;;  %v264_v27 = vsel %vm262_vm6, %v103_v21, %v217_v26  ;;  %v115_v26 = vsel %vm83_vm2, %v3355_v22, %v2379_v1 }
  0x9c   :  { %324 = vst.msk [vmem:[#allocation2 + $0x21] sm:$0xff] %vm279_vm0, %v264_v27  ;;  %v114_v27 = vsel %vm82_vm3, %v3361_v24, %v2378_v30 }
  0x9d   :  { %v225_v48 = vpop.permute.xlu1 %224 }
  0x9e   :  { %v223_v35 = vpop.permute.xlu0 %222  ;;  %v268_v50 = vsel %vm262_vm6, %v107_v37, %v225_v48  ;;  %v3768_v55 = vld [vmem:[#allocation2 + $0x32] sm:$0xff]  ;;  %v2381_v37 = vadd.f32 -1.0, %v3620_v56 }
  0x9f   :  { %v267_v8 = vsel %vm262_vm6, %v106_v39, %v223_v35  ;;  %328 = vst.msk [vmem:[#allocation2 + $0x61] sm:$0xff] %vm279_vm0, %v268_v50  ;;  %v3761_v36 = vld [vmem:[#allocation2 + $0x11] sm:$0xff] }
  0xa0   :  { %327 = vst.msk [vmem:[#allocation2 + $0x51] sm:$0xff] %vm279_vm0, %v267_v8  ;;  %v2732_v53 = vpack.i.bf16 %v3761_v36, %v355_v49  ;;  %v3780_v62 = vld [vmem:[#allocation2 + $0x10] sm:$0xff]  ;;  %v117_v8 = vsel %vm85_vm4, %v3383_v33, %v2381_v37 }
  0xa1   :  { %v229_v57 = vpop.permute.xlu1 %228  ;;  %v3799_v10 = vld [vmem:[#allocation2 + $0x31] sm:$0xff] }
  0xa2   :  { %2733 = vrot.lane.b32.xlu1 %v2732_v53, %s3247_s1  ;;  %v270_v11 = vsel %vm262_vm6, %v109_v52, %v229_v57  ;;  %v227_v58 = vpop.permute.xlu0 %226  ;;  %v3774_v59 = vld [vmem:[#allocation2 + $0x42] sm:$0xff]  ;;  %v3805_v0 = vld [vmem:[#allocation2 + $0x12] sm:$0xff]  ;;  %v116_v52 = vsel %vm84_vm5, %v3417_v41, %v2380_v45 }
  0xa3   :  { %330 = vst.msk [vmem:[#allocation2 + $0x81] sm:$0xff] %vm279_vm0, %v270_v11  ;;  %v269_v42 = vsel %vm262_vm6, %v108_v54, %v227_v58  ;;  %v3782_v63 = vld [vmem:[#allocation2 + $0x20] sm:$0xff]  ;;  %v2742_v3 = vpack.i.bf16 %v3774_v59, %v3768_v55  ;;  %v3817_v18 = vld [vmem:[#allocation2 + $0x30] sm:$0xff] }
  0xa4   :  { %329 = vst.msk [vmem:[#allocation2 + $0x71] sm:$0xff] %vm279_vm0, %v269_v42  ;;  %v2727_v14 = vpack.i.bf16 %v3782_v63, %v3780_v62  ;;  %v3795_v5 = vld [vmem:[#allocation2 + $0x22] sm:$0xff]  ;;  %v363_v57 = vld [vmem:[#allocation2 + $0x91] sm:$0xff] }
  0xa5   :  { %v3797_v7 = vld [vmem:[#allocation2 + $0x21] sm:$0xff]  ;;  %v233_v13 = vpop.permute.xlu1 %232  ;;  %v2737_v31 = vpack.i.bf16 %v3795_v5, %v3805_v0 }
  0xa6   :  { %2728 = vrot.lane.b32.xlu0 %v2727_v14, %s3247_s1  ;;  %2743 = vrot.lane.b32.xlu1 %v2742_v3, %s3247_s1  ;;  %v272_v44 = vsel %vm262_vm6, %v111_v61, %v233_v13  ;;  %v231_v15 = vpop.permute.xlu0 %230  ;;  %v2752_v17 = vpack.i.bf16 %v3799_v10, %v3797_v7  ;;  %v3821_v19 = vld [vmem:[#allocation2 + $0x40] sm:$0xff] }
  0xa7   :  { %332 = vst.msk [vmem:[#allocation2 + $0xb1] sm:$0xff] %vm279_vm0, %v272_v44  ;;  %v271_v16 = vsel %vm262_vm6, %v110_v43, %v231_v15  ;;  %v3823_v20 = vld [vmem:[#allocation2 + $0x41] sm:$0xff]  ;;  %v3825_v46 = vld [vmem:[#allocation2 + $0x51] sm:$0xff]  ;;  %v2747_v38 = vpack.i.bf16 %v3821_v19, %v3817_v18 }
  0xa8   :  { %331 = vst.msk [vmem:[#allocation2 + $0xa1] sm:$0xff] %vm279_vm0, %v271_v16  ;;  %v3830_v25 = vld [vmem:[#allocation2 + $0x60] sm:$0xff]  ;;  %v3834_v34 = vld [vmem:[#allocation2 + $0x50] sm:$0xff]  ;;  %v2762_v39 = vpack.i.bf16 %v3825_v46, %v3823_v20 }
  0xa9   :  { %v237_v47 = vpop.permute.xlu1 %236  ;;  %v2757_v22 = vpack.i.bf16 %v3830_v25, %v3834_v34  ;;  %v3858_v56 = vld [vmem:[#allocation2 + $0x62] sm:$0xff]  ;;  %v3861_v35 = vld [vmem:[#allocation2 + $0x52] sm:$0xff] }
  0xaa   :  { %2738 = vrot.lane.b32.xlu0 %v2737_v31, %s3247_s1  ;;  %2753 = vrot.lane.b32.xlu1 %v2752_v17, %s3247_s1  ;;  %v274_v21 = vsel %vm262_vm6, %v113_v28, %v237_v47  ;;  %v235_v23 = vpop.permute.xlu0 %234  ;;  %v426_v32 = vld [vmem:[#allocation2 + $0x82] sm:$0xff]  ;;  %v2767_v54 = vpack.i.bf16 %v3858_v56, %v3861_v35 }
  0xab   :  { %334 = vst.msk [vmem:[#allocation2 + $0xd1] sm:$0xff] %vm279_vm0, %v274_v21  ;;  %v273_v2 = vsel %vm262_vm6, %v112_v29, %v235_v23  ;;  %v3836_v6 = vld [vmem:[#allocation2 + $0x72] sm:$0xff]  ;;  %v3863_v60 = vld [vmem:[#allocation2 + $0x61] sm:$0xff] }
  0xac   :  { %333 = vst.msk [vmem:[#allocation2 + $0xc1] sm:$0xff] %vm279_vm0, %v273_v2  ;;  %v2772_v24 = vpack.i.bf16 %v426_v32, %v3836_v6  ;;  %v3865_v50 = vld [vmem:[#allocation2 + $0x71] sm:$0xff]  ;;  %v394_v61 = vld [vmem:[#allocation2 + $0x80] sm:$0xff] }
  0xad   :  { %v241_v48 = vpop.permute.xlu1 %240  ;;  %v2782_v40 = vpack.i.bf16 %v3865_v50, %v3863_v60  ;;  %v3881_v33 = vld [vmem:[#allocation2 + $0x70] sm:$0xff] }
  0xae   :  { %2748 = vrot.lane.b32.xlu0 %v2747_v38, %s3247_s1  ;;  %2763 = vrot.lane.b32.xlu1 %v2762_v39, %s3247_s1  ;;  %v276_v49 = vsel %vm262_vm6, %v115_v26, %v241_v48  ;;  %v239_v9 = vpop.permute.xlu0 %238  ;;  %v2777_v42 = vpack.i.bf16 %v394_v61, %v3881_v33  ;;  %v3892_v4 = vld [vmem:[#allocation2 + $0xb0] sm:$0xff] }
  0xaf   :  { %336 = vst.msk [vmem:[#allocation2 + $0xf1] sm:$0xff] %vm279_vm0, %v276_v49  ;;  %v275_v51 = vsel %vm262_vm6, %v114_v27, %v239_v9  ;;  %v3883_v12 = vld [vmem:[#allocation2 + $0xa1] sm:$0xff]  ;;  %v3906_v28 = vld [vmem:[#allocation2 + $0xb2] sm:$0xff] }
  0xb0   :  { %335 = vst.msk [vmem:[#allocation2 + $0xe1] sm:$0xff] %vm279_vm0, %v275_v51  ;;  %v2792_v3 = vpack.i.bf16 %v3883_v12, %v363_v57  ;;  %v3894_v14 = vld [vmem:[#allocation2 + $0xa0] sm:$0xff]  ;;  %v3910_v29 = vld [vmem:[#allocation2 + $0xb1] sm:$0xff] }
  0xb1   :  { %v2787_v44 = vpack.i.bf16 %v3892_v4, %v3894_v14  ;;  %v3908_v16 = vld [vmem:[#allocation2 + $0xa2] sm:$0xff] }
  0xb2   :  { %2758 = vrot.lane.b32.xlu0 %v2757_v22, %s3247_s1  ;;  %2773 = vrot.lane.b32.xlu1 %v2772_v24, %s3247_s1  ;;  %v3898_v13 = vld [vmem:[#allocation2 + $0xd2] sm:$0xff]  ;;  %v2797_v30 = vpack.i.bf16 %v3906_v28, %v3908_v16 }
  0xb3   :  { %v3896_v43 = vld [vmem:[#allocation2 + $0xc2] sm:$0xff]  ;;  %v3920_v17 = vld [vmem:[#allocation2 + $0xd0] sm:$0xff] }
  0xb4   :  { %v2802_v15 = vpack.i.bf16 %v3898_v13, %v3896_v43  ;;  %v3912_v1 = vld [vmem:[#allocation2 + $0xc1] sm:$0xff]  ;;  %v3924_v21 = vld [vmem:[#allocation2 + $0xd1] sm:$0xff] }
  0xb5   :  { %v2812_v31 = vpack.i.bf16 %v3912_v1, %v3910_v29  ;;  %v3922_v47 = vld [vmem:[#allocation2 + $0xc0] sm:$0xff] }
  0xb6   :  { %v245_v53 = vpop.permute.xlu1 %244  ;;  %2768 = vrot.lane.b32.xlu0 %v2767_v54, %s3247_s1  ;;  %2783 = vrot.lane.b32.xlu1 %v2782_v40, %s3247_s1  ;;  %v2807_v2 = vpack.i.bf16 %v3920_v17, %v3922_v47  ;;  %v3934_v26 = vld [vmem:[#allocation2 + $0xf0] sm:$0xff] }
  0xb7   :  { %v278_v11 = vsel %vm262_vm6, %v117_v8, %v245_v53  ;;  %v243_v58 = vpop.permute.xlu0 %242  ;;  %v3926_v23 = vld [vmem:[#allocation2 + $0xe1] sm:$0xff]  ;;  %v3945_v48 = vld [vmem:[#allocation2 + $0xf2] sm:$0xff] }
  0xb8   :  { %338 = vst.msk [vmem:[#allocation2 + $0x111] sm:$0xff] %vm279_vm0, %v278_v11  ;;  %v277_v41 = vsel %vm262_vm6, %v116_v52, %v243_v58  ;;  %v2822_v32 = vpack.i.bf16 %v3926_v23, %v3924_v21  ;;  %v3936_v27 = vld [vmem:[#allocation2 + $0xe0] sm:$0xff]  ;;  %v3949_v24 = vld [vmem:[#allocation2 + $0xf1] sm:$0xff] }
  0xb9   :  { %337 = vst.msk [vmem:[#allocation2 + $0x101] sm:$0xff] %vm279_vm0, %v277_v41  ;;  %v2817_v39 = vpack.i.bf16 %v3934_v26, %v3936_v27  ;;  %v3947_v22 = vld [vmem:[#allocation2 + $0xe2] sm:$0xff] }
  0xba   :  { %2778 = vrot.lane.b32.xlu0 %v2777_v42, %s3247_s1  ;;  %2793 = vrot.lane.b32.xlu1 %v2792_v3, %s3247_s1  ;;  %v2827_v9 = vpack.i.bf16 %v3945_v48, %v3947_v22  ;;  %v339_v11 = vld [vmem:[#allocation2] sm:$0xff] }
  0xbb   :  { %v371_v41 = vld [vmem:[#allocation2 + $0x2] sm:$0xff] }
  0xbe   :  { %2788 = vrot.lane.b32.xlu0 %v2787_v44, %s3247_s1  ;;  %2803 = vrot.lane.b32.xlu1 %v2802_v15, %s3247_s1 }
  0xbf   :  { %v434_v38 = vld [vmem:[#allocation2 + $0x112] sm:$0xff] }
  0xc0   :  { %v3938_v37 = vld [vmem:[#allocation2 + $0x102] sm:$0xff]  ;;  %v402_v52 = vld [vmem:[#allocation2 + $0x110] sm:$0xff] }
  0xc1   :  { %v2832_v45 = vpack.i.bf16 %v434_v38, %v3938_v37  ;;  %v3951_v49 = vld [vmem:[#allocation2 + $0x101] sm:$0xff] }
  0xc2   :  { %2798 = vrot.lane.b32.xlu0 %v2797_v30, %s3247_s1  ;;  %2813 = vrot.lane.b32.xlu1 %v2812_v31, %s3247_s1  ;;  %v2842_v51 = vpack.i.bf16 %v3951_v49, %v3949_v24  ;;  %v3959_v8 = vld [vmem:[#allocation2 + $0x100] sm:$0xff] }
  0xc3   :  { %v2837_v53 = vpack.i.bf16 %v402_v52, %v3959_v8 }
  0xc6   :  { %2808 = vrot.lane.b32.xlu0 %v2807_v2, %s3247_s1  ;;  %2823 = vrot.lane.b32.xlu1 %v2822_v32, %s3247_s1 }
  0xca   :  { %2818 = vrot.lane.b32.xlu0 %v2817_v39, %s3247_s1  ;;  %2833 = vrot.lane.b32.xlu1 %v2832_v45, %s3247_s1 }
  0xce   :  { %2828 = vrot.lane.b32.xlu0 %v2827_v9, %s3247_s1  ;;  %2843 = vrot.lane.b32.xlu1 %v2842_v51, %s3247_s1 }
  0xd2   :  { %2838 = vrot.lane.b32.xlu0 %v2837_v53, %s3247_s1 }
 0x114   :  { %v2734_v54 = vpop.permute.xlu1 %2733 }
 0x115   :  { %v2736_v40 = vunpack.i.h.bf16 %v2734_v54  ;;  %v2735_v57 = vunpack.i.l.bf16 %v2734_v54 }
 0x117   :  { %v627_v30 = vsel %vm279_vm0, %v339_v11, %v2735_v57  ;;  %v628_v31 = vsel %vm279_vm0, %v3780_v62, %v2736_v40 }
 0x118   :  { %v2729_v58 = vpop.permute.xlu0 %2728  ;;  %v2744_v61 = vpop.permute.xlu1 %2743  ;;  %v675_v52 = vpack.c.bf16 %v628_v31, %v627_v30 }
 0x119   :  { %v2731_v42 = vunpack.i.h.bf16 %v2729_v58  ;;  %v2730_v3 = vunpack.i.l.bf16 %v2729_v58  ;;  %v2746_v44 = vunpack.i.h.bf16 %v2744_v61  ;;  %v2745_v15 = vunpack.i.l.bf16 %v2744_v61 }
 0x11b   :  { %v643_v2 = vsel %vm279_vm0, %v371_v41, %v2730_v3  ;;  %v644_v32 = vsel %vm279_vm0, %v3805_v0, %v2731_v42  ;;  %v661_v57 = vsel %vm279_vm0, %v3799_v10, %v2745_v15  ;;  %v662_v62 = vsel %vm279_vm0, %v3823_v20, %v2746_v44 }
 0x11c   :  { %v2739_v38 = vpop.permute.xlu0 %2738  ;;  %v2754_v39 = vpop.permute.xlu1 %2753  ;;  %v676_v45 = vpack.c.bf16 %v644_v32, %v643_v2  ;;  %v680_v3 = vpack.c.bf16 %v662_v62, %v661_v57 }
 0x11d   :  { %v2741_v9 = vunpack.i.h.bf16 %v2739_v38  ;;  %v2740_v51 = vunpack.i.l.bf16 %v2739_v38  ;;  %v2756_v53 = vunpack.i.h.bf16 %v2754_v39  ;;  %v2755_v54 = vunpack.i.l.bf16 %v2754_v39 }
 0x11e   :  { %930 = vmatprep.mubr.bf16.mxu0 %v676_v45 }
 0x11f   :  { %931 = vmatmul.mubr.bf16.vlgmr.msra.gmra.mxu0 %v675_v52  ;;  %v659_v40 = vsel %vm279_vm0, %v3761_v36, %v2740_v51  ;;  %v660_v0 = vsel %vm279_vm0, %v3797_v7, %v2741_v9  ;;  %v629_v10 = vsel %vm279_vm0, %v3782_v63, %v2755_v54  ;;  %v630_v20 = vsel %vm279_vm0, %v3817_v18, %v2756_v53  ;;  %v410_v54 = vld [vmem:[#allocation2 + $0x81] sm:$0xff] }
 0x120   :  { %v2749_v11 = vpop.permute.xlu0 %2748  ;;  %v2764_v58 = vpop.permute.xlu1 %2763  ;;  %v677_v61 = vpack.c.bf16 %v660_v0, %v659_v40  ;;  %v678_v32 = vpack.c.bf16 %v630_v20, %v629_v10 }
 0x121   :  { %v2751_v41 = vunpack.i.h.bf16 %v2749_v11  ;;  %v2750_v42 = vunpack.i.l.bf16 %v2749_v11  ;;  %v2766_v38 = vunpack.i.h.bf16 %v2764_v58  ;;  %v2765_v39 = vunpack.i.l.bf16 %v2764_v58 }
 0x122   :  { %2672 = vmatprep.mubr.bf16.mxu1 %v677_v61 }
 0x123   :  { %2673 = vmatmul.mubr.bf16.vlgmr.msra.gmra.mxu1 %v680_v3  ;;  %v645_v36 = vsel %vm279_vm0, %v3795_v5, %v2750_v42  ;;  %v646_v7 = vsel %vm279_vm0, %v3768_v55, %v2751_v41  ;;  %v631_v57 = vsel %vm279_vm0, %v3821_v19, %v2765_v39  ;;  %v632_v62 = vsel %vm279_vm0, %v3834_v34, %v2766_v38 }
 0x124   :  { %v2759_v44 = vpop.permute.xlu0 %2758  ;;  %v2774_v15 = vpop.permute.xlu1 %2773  ;;  %v679_v30 = vpack.c.bf16 %v646_v7, %v645_v36  ;;  %v681_v19 = vpack.c.bf16 %v632_v62, %v631_v57  ;;  %v379_v7 = vld [vmem:[#allocation2 + $0x92] sm:$0xff] }
 0x125   :  { %v2761_v31 = vunpack.i.h.bf16 %v2759_v44  ;;  %v2760_v2 = vunpack.i.l.bf16 %v2759_v44  ;;  %v2776_v45 = vunpack.i.h.bf16 %v2774_v15  ;;  %v2775_v63 = vunpack.i.l.bf16 %v2774_v15 }
 0x126   :  { %938 = vmatprep.mubr.bf16.mxu0 %v679_v30 }
 0x127   :  { %939 = vmatmul.mubr.bf16.gmra.mxu0 %v678_v32  ;;  %v647_v18 = vsel %vm279_vm0, %v3774_v59, %v2760_v2  ;;  %v648_v5 = vsel %vm279_vm0, %v3861_v35, %v2761_v31  ;;  %v665_v40 = vsel %vm279_vm0, %v3865_v50, %v2775_v63  ;;  %v666_v59 = vsel %vm279_vm0, %v410_v54, %v2776_v45 }
 0x128   :  { %v2769_v9 = vpop.permute.xlu0 %2768  ;;  %v2784_v55 = vpop.permute.xlu1 %2783  ;;  %v682_v51 = vpack.c.bf16 %v648_v5, %v647_v18  ;;  %v686_v3 = vpack.c.bf16 %v666_v59, %v665_v40 }
 0x129   :  { %v2771_v52 = vunpack.i.h.bf16 %v2769_v9  ;;  %v2770_v53 = vunpack.i.l.bf16 %v2769_v9  ;;  %v2786_v10 = vunpack.i.h.bf16 %v2784_v55  ;;  %v2785_v34 = vunpack.i.l.bf16 %v2784_v55 }
 0x12a   :  { %946 = vmatprep.mubr.bf16.mxu0 %v682_v51 }
 0x12b   :  { %v663_v35 = vsel %vm279_vm0, %v3825_v46, %v2770_v53  ;;  %v664_v0 = vsel %vm279_vm0, %v3863_v60, %v2771_v52  ;;  %v633_v2 = vsel %vm279_vm0, %v3830_v25, %v2785_v34  ;;  %v634_v32 = vsel %vm279_vm0, %v3881_v33, %v2786_v10  ;;  %v347_v52 = vld [vmem:[#allocation2 + $0x90] sm:$0xff] }
 0x12c   :  { %v2779_v11 = vpop.permute.xlu0 %2778  ;;  %v2794_v58 = vpop.permute.xlu1 %2793  ;;  %v683_v61 = vpack.c.bf16 %v664_v0, %v663_v35  ;;  %v684_v5 = vpack.c.bf16 %v634_v32, %v633_v2 }
 0x12d   :  { %v2781_v41 = vunpack.i.h.bf16 %v2779_v11  ;;  %v2780_v42 = vunpack.i.l.bf16 %v2779_v11  ;;  %v2796_v45 = vunpack.i.h.bf16 %v2794_v58  ;;  %v2795_v9 = vunpack.i.l.bf16 %v2794_v58 }
 0x12e   :  { %2676 = vmatprep.mubr.bf16.mxu1 %v683_v61 }
 0x12f   :  { %947 = vmatmul.mubr.bf16.gmra.mxu0 %v681_v19  ;;  %2677 = vmatmul.mubr.bf16.gmra.mxu1 %v686_v3  ;;  %v649_v50 = vsel %vm279_vm0, %v3858_v56, %v2780_v42  ;;  %v650_v46 = vsel %vm279_vm0, %v3836_v6, %v2781_v41 }
 0x130   :  { %v2789_v20 = vpop.permute.xlu0 %2788  ;;  %v2804_v60 = vpop.permute.xlu1 %2803  ;;  %v685_v36 = vpack.c.bf16 %v650_v46, %v649_v50  ;;  %v418_v46 = vld [vmem:[#allocation2 + $0x111] sm:$0xff] }
 0x131   :  { %v2791_v44 = vunpack.i.h.bf16 %v2789_v20  ;;  %v2790_v15 = vunpack.i.l.bf16 %v2789_v20  ;;  %v2806_v30 = vunpack.i.h.bf16 %v2804_v60  ;;  %v2805_v31 = vunpack.i.l.bf16 %v2804_v60 }
 0x132   :  { %954 = vmatprep.mubr.bf16.mxu0 %v685_v36 }
 0x133   :  { %v651_v56 = vsel %vm279_vm0, %v379_v7, %v2790_v15  ;;  %v652_v6 = vsel %vm279_vm0, %v3908_v16, %v2791_v44  ;;  %v669_v51 = vsel %vm279_vm0, %v3912_v1, %v2805_v31  ;;  %v670_v25 = vsel %vm279_vm0, %v3924_v21, %v2806_v30 }
 0x134   :  { %v2799_v38 = vpop.permute.xlu0 %2798  ;;  %v2814_v39 = vpop.permute.xlu1 %2813  ;;  %v688_v55 = vpack.c.bf16 %v652_v6, %v651_v56  ;;  %v692_v59 = vpack.c.bf16 %v670_v25, %v669_v51  ;;  %v635_v1 = vsel %vm279_vm0, %v347_v52, %v2795_v9  ;;  %v636_v21 = vsel %vm279_vm0, %v3894_v14, %v2796_v45 }
 0x135   :  { %v2801_v63 = vunpack.i.h.bf16 %v2799_v38  ;;  %v2800_v18 = vunpack.i.l.bf16 %v2799_v38  ;;  %v2816_v11 = vunpack.i.h.bf16 %v2814_v39  ;;  %v687_v58 = vpack.c.bf16 %v636_v21, %v635_v1 }
 0x136   :  { %v2815_v61 = vunpack.i.l.bf16 %v2814_v39 }
 0x137   :  { %955 = vmatmul.mubr.bf16.gmra.mxu0 %v684_v5  ;;  %v667_v33 = vsel %vm279_vm0, %v3883_v12, %v2800_v18  ;;  %v668_v16 = vsel %vm279_vm0, %v3910_v29, %v2801_v63 }
 0x138   :  { %v2809_v53 = vpop.permute.xlu0 %2808  ;;  %v2824_v54 = vpop.permute.xlu1 %2823  ;;  %962 = vmatprep.mubr.bf16.mxu0 %v688_v55  ;;  %v689_v57 = vpack.c.bf16 %v668_v16, %v667_v33 }
 0x139   :  { %v2811_v62 = vunpack.i.h.bf16 %v2809_v53  ;;  %v2810_v40 = vunpack.i.l.bf16 %v2809_v53  ;;  %v2826_v2 = vunpack.i.h.bf16 %v2824_v54 }
 0x13a   :  { %2680 = vmatprep.mubr.bf16.mxu1 %v689_v57 }
 0x13b   :  { %2681 = vmatmul.mubr.bf16.gmra.mxu1 %v692_v59  ;;  %v653_v12 = vsel %vm279_vm0, %v3906_v28, %v2810_v40  ;;  %v654_v29 = vsel %vm279_vm0, %v3896_v43, %v2811_v62  ;;  %v637_v28 = vsel %vm279_vm0, %v3892_v4, %v2815_v61  ;;  %v638_v43 = vsel %vm279_vm0, %v3922_v47, %v2816_v11 }
 0x13c   :  { %v2819_v35 = vpop.permute.xlu0 %2818  ;;  %v2834_v0 = vpop.permute.xlu1 %2833  ;;  %v691_v19 = vpack.c.bf16 %v654_v29, %v653_v12  ;;  %v690_v47 = vpack.c.bf16 %v638_v43, %v637_v28 }
 0x13d   :  { %v2836_v41 = vunpack.i.h.bf16 %v2834_v0  ;;  %v2835_v42 = vunpack.i.l.bf16 %v2834_v0  ;;  %v2821_v3 = vunpack.i.h.bf16 %v2819_v35  ;;  %v2820_v10 = vunpack.i.l.bf16 %v2819_v35 }
 0x13f   :  { %963 = vmatmul.mubr.bf16.gmra.mxu0 %v687_v58  ;;  %v673_v20 = vsel %vm279_vm0, %v3951_v49, %v2835_v42  ;;  %v674_v60 = vsel %vm279_vm0, %v418_v46, %v2836_v41  ;;  %v655_v44 = vsel %vm279_vm0, %v3898_v13, %v2820_v10  ;;  %v656_v4 = vsel %vm279_vm0, %v3947_v22, %v2821_v3 }
 0x140   :  { %v2829_v34 = vpop.permute.xlu0 %2828  ;;  %970 = vmatprep.mubr.bf16.mxu0 %v691_v19  ;;  %v698_v31 = vpack.c.bf16 %v674_v60, %v673_v20  ;;  %v2825_v49 = vunpack.i.l.bf16 %v2824_v54  ;;  %v694_v32 = vpack.c.bf16 %v656_v4, %v655_v44  ;;  %v640_v13 = vsel %vm279_vm0, %v3936_v27, %v2826_v2  ;;  %v2844_v22 = vpop.permute.xlu1 %2843 }
 0x141   :  { %v2831_v14 = vunpack.i.h.bf16 %v2829_v34  ;;  %v2830_v50 = vunpack.i.l.bf16 %v2829_v34  ;;  %v2846_v45 = vunpack.i.h.bf16 %v2844_v22  ;;  %v2845_v63 = vunpack.i.l.bf16 %v2844_v22 }
 0x143   :  { %v671_v36 = vsel %vm279_vm0, %v3926_v23, %v2830_v50  ;;  %v672_v7 = vsel %vm279_vm0, %v3949_v24, %v2831_v14  ;;  %v639_v23 = vsel %vm279_vm0, %v3920_v17, %v2825_v49  ;;  %v641_v5 = vsel %vm279_vm0, %v3934_v26, %v2845_v63 }
 0x144   :  { %v2839_v15 = vpop.permute.xlu0 %2838  ;;  %v695_v30 = vpack.c.bf16 %v672_v7, %v671_v36  ;;  %v693_v39 = vpack.c.bf16 %v640_v13, %v639_v23  ;;  %v642_v17 = vsel %vm279_vm0, %v3959_v8, %v2846_v45 }
 0x145   :  { %v2841_v56 = vunpack.i.h.bf16 %v2839_v15  ;;  %v2840_v6 = vunpack.i.l.bf16 %v2839_v15  ;;  %v696_v27 = vpack.c.bf16 %v642_v17, %v641_v5 }
 0x146   :  { %2684 = vmatprep.mubr.bf16.mxu1 %v695_v30 }
 0x147   :  { %971 = vmatmul.mubr.bf16.gmra.mxu0 %v690_v47  ;;  %2685 = vmatmul.mubr.bf16.gmra.mxu1 %v698_v31  ;;  %v657_v24 = vsel %vm279_vm0, %v3945_v48, %v2840_v6  ;;  %v658_v38 = vsel %vm279_vm0, %v3938_v37, %v2841_v56  ;;  %v4058_v37 = vld [vmem:[%s4775_s2] ss:$0 sm:$0xff] }
 0x148   :  { %978 = vmatprep.mubr.bf16.mxu0 %v694_v32  ;;  %v697_v18 = vpack.c.bf16 %v658_v38, %v657_v24 }
 0x14f   :  { %979 = vmatmul.mubr.bf16.gmra.mxu0 %v693_v39 }
 0x150   :  { %986 = vmatprep.mubr.bf16.mxu0 %v697_v18 }
 0x157   :  { %987 = vmatmul.mubr.bf16.gmra.mxu0 %v696_v27 }
 0x1df   :  { %v2512_v9 = vpop.f32.mrf.mxu0 }
 0x1e1   :  { %v2513_v55 = vpop.f32.mrf.mxu0 }
 0x1e2   :  { %v2514_v48 = vadd.f32 %v2513_v55, %v2512_v9 }
 0x1e3   :  { %v2515_v51 = vpop.f32.mrf.mxu0  ;;  %v2674_v25 = vpop.f32.mrf.mxu1 }
 0x1e4   :  { %v933_v33 = vadd.f32 %v2514_v48, %v4058_v37 }
 0x1e5   :  { %v2516_v16 = vpop.f32.mrf.mxu0  ;;  %v1029_v52 = vpop.f32.mrf.mxu1 }
 0x1e6   :  { %v2517_v26 = vadd.f32 %v2516_v16, %v2515_v51  ;;  %v4061_v53 = vadd.f32 %v1029_v52, %v933_v33 }
 0x1e7   :  { %v2518_v8 = vpop.f32.mrf.mxu0  ;;  %v2675_v54 = vpop.f32.mrf.mxu1 }
 0x1e8   :  { %v1092_v57 = vmul.f32 1.442695, %v4061_v53  ;;  %v936_v62 = vadd.f32 %v2517_v26, %v4058_v37  ;;  %vm1124_vm7 = vcmp.gt.f32.partialorder %v4061_v53, 0.0  ;;  %vm1172_vm11 = vcmp.lt.f32.partialorder %v4061_v53, 0.0 }
 0x1e9   :  { %v2519_v40 = vpop.f32.mrf.mxu0  ;;  %v1032_v59 = vpop.f32.mrf.mxu1 }
 0x1ea   :  { %3079 = vpow2.f32 %v1092_v57  ;;  %v2520_v1 = vadd.f32 %v2519_v40, %v2518_v8  ;;  %v4065_v21 = vadd.f32 %v1032_v59, %v936_v62  ;;  %v1188_v40 = vsub.f32 0.0, %v4061_v53 }
 0x1eb   :  { %v2521_v12 = vpop.f32.mrf.mxu0 }
 0x1ec   :  { %v941_v29 = vadd.f32 %v2520_v1, %v4058_v37  ;;  %v1094_v35 = vmul.f32 1.442695, %v4065_v21  ;;  %vm1125_vm8 = vcmp.gt.f32.partialorder %v4065_v21, 0.0  ;;  %vm1173_vm13 = vcmp.lt.f32.partialorder %v4065_v21, 0.0 }
 0x1ed   :  { %v2522_v0 = vpop.f32.mrf.mxu0 }
 0x1ee   :  { %v4069_v11 = vadd.f32 %v2674_v25, %v941_v29  ;;  %3081 = vpow2.f32 %v1094_v35  ;;  %v2523_v58 = vadd.f32 %v2522_v0, %v2521_v12 }
 0x1ef   :  { %v2524_v61 = vpop.f32.mrf.mxu0  ;;  %v2678_v41 = vpop.f32.mrf.mxu1 }
 0x1f0   :  { %v1096_v42 = vmul.f32 1.442695, %v4069_v11  ;;  %v944_v19 = vadd.f32 %v2523_v58, %v4058_v37  ;;  %vm1126_vm9 = vcmp.gt.f32.partialorder %v4069_v11, 0.0  ;;  %vm1174_vm15 = vcmp.lt.f32.partialorder %v4069_v11, 0.0 }
 0x1f1   :  { %v2525_v3 = vpop.f32.mrf.mxu0  ;;  %v1045_v10 = vpop.f32.mrf.mxu1 }
 0x1f2   :  { %3083 = vpow2.f32 %v1096_v42  ;;  %v4073_v34 = vadd.f32 %v2675_v54, %v944_v19  ;;  %v2526_v14 = vadd.f32 %v2525_v3, %v2524_v61 }
 0x1f3   :  { %v2527_v50 = vpop.f32.mrf.mxu0  ;;  %v2679_v43 = vpop.f32.mrf.mxu1 }
 0x1f4   :  { %v1098_v46 = vmul.f32 1.442695, %v4073_v34  ;;  %v949_v28 = vadd.f32 %v2526_v14, %v4058_v37  ;;  %vm1127_vm10 = vcmp.gt.f32.partialorder %v4073_v34, 0.0  ;;  %v1189_v14 = vsub.f32 0.0, %v4065_v21 }
 0x1f5   :  { %v2528_v20 = vpop.f32.mrf.mxu0  ;;  %v1048_v30 = vpop.f32.mrf.mxu1  ;;  %vm1175_vm2 = vcmp.lt.f32.partialorder %v4073_v34, 0.0 }
 0x1f6   :  { %3085 = vpow2.f32 %v1098_v46  ;;  %v4077_v60 = vadd.f32 %v1045_v10, %v949_v28  ;;  %v2529_v36 = vadd.f32 %v2528_v20, %v2527_v50 }
 0x1f7   :  { %v3080_v7 = vpop.eup %3079  ;;  %v2530_v44 = vpop.f32.mrf.mxu0 }
 0x1f8   :  { %v1100_v4 = vmul.f32 1.442695, %v4077_v60  ;;  %v952_v15 = vadd.f32 %v2529_v36, %v4058_v37  ;;  %3087 = vrcp.f32 %v3080_v7  ;;  %v2423_v31 = vadd.f32 -1.0, %v3080_v7 }
 0x1f9   :  { %v2531_v47 = vpop.f32.mrf.mxu0  ;;  %vm1128_vm12 = vcmp.gt.f32.partialorder %v4077_v60, 0.0  ;;  %vm1176_vm4 = vcmp.lt.f32.partialorder %v4077_v60, 0.0 }
 0x1fa   :  { %3089 = vpow2.f32 %v1100_v4  ;;  %v4081_v2 = vadd.f32 %v1048_v30, %v952_v15  ;;  %v2532_v49 = vadd.f32 %v2531_v47, %v2530_v44  ;;  %v4085_v6 = vsel %vm1124_vm7, %v4061_v53, %v2423_v31 }
 0x1fb   :  { %v3082_v32 = vpop.eup %3081  ;;  %v2533_v56 = vpop.f32.mrf.mxu0  ;;  %v1190_v31 = vsub.f32 0.0, %v4069_v11 }
 0x1fc   :  { %v1102_v23 = vmul.f32 1.442695, %v4081_v2  ;;  %v957_v13 = vadd.f32 %v2532_v49, %v4058_v37  ;;  %3091 = vrcp.f32 %v3082_v32  ;;  %v4089_v22 = vpop.f32.mrf.mxu1  ;;  %v2424_v38 = vadd.f32 -1.0, %v3082_v32 }
 0x1fd   :  { %v2534_v24 = vpop.f32.mrf.mxu0  ;;  %vm1129_vm14 = vcmp.gt.f32.partialorder %v4081_v2, 0.0  ;;  %vm1177_vm7 = vcmp.lt.f32.partialorder %v4081_v2, 0.0 }
 0x1fe   :  { %3093 = vpow2.f32 %v1102_v23  ;;  %v4091_v39 = vadd.f32 %v2678_v41, %v957_v13  ;;  %v2535_v45 = vadd.f32 %v2534_v24, %v2533_v56  ;;  %v4095_v5 = vsel %vm1125_vm8, %v4065_v21, %v2424_v38  ;;  %v1061_v9 = vpop.f32.mrf.mxu1 }
 0x1ff   :  { %v3084_v63 = vpop.eup %3083  ;;  %v2536_v18 = vpop.f32.mrf.mxu0 }
 0x200   :  { %v1104_v17 = vmul.f32 1.442695, %v4091_v39  ;;  %v960_v27 = vadd.f32 %v2535_v45, %v4058_v37  ;;  %3095 = vrcp.f32 %v3084_v63  ;;  %v2425_v48 = vadd.f32 -1.0, %v3084_v63  ;;  %v4107_v57 = vpop.f32.mrf.mxu1 }
 0x201   :  { %v2537_v55 = vpop.f32.mrf.mxu0  ;;  %vm1130_vm1 = vcmp.gt.f32.partialorder %v4091_v39, 0.0 }
 0x202   :  { %3097 = vpow2.f32 %v1104_v17  ;;  %v4099_v51 = vadd.f32 %v2679_v43, %v960_v27  ;;  %v2538_v25 = vadd.f32 %v2537_v55, %v2536_v18  ;;  %v4103_v52 = vsel %vm1126_vm9, %v4069_v11, %v2425_v48  ;;  %v1064_v3 = vpop.f32.mrf.mxu1 }
 0x203   :  { %v3086_v33 = vpop.eup %3085  ;;  %v2539_v16 = vpop.f32.mrf.mxu0  ;;  %vm1178_vm9 = vcmp.lt.f32.partialorder %v4091_v39, 0.0 }
 0x204   :  { %v1106_v26 = vmul.f32 1.442695, %v4099_v51  ;;  %v965_v8 = vadd.f32 %v2538_v25, %v4058_v37  ;;  %3099 = vrcp.f32 %v3086_v33  ;;  %v2426_v59 = vadd.f32 -1.0, %v3086_v33 }
 0x205   :  { %v3088_v54 = vpop.eup %3087  ;;  %v2540_v62 = vpop.f32.mrf.mxu0  ;;  %vm1131_vm3 = vcmp.gt.f32.partialorder %v4099_v51, 0.0 }
 0x206   :  { %3101 = vpow2.f32 %v1106_v26  ;;  %v4111_v1 = vadd.f32 %v1061_v9, %v965_v8  ;;  %v2541_v12 = vadd.f32 %v2540_v62, %v2539_v16  ;;  %v2439_v29 = vadd.f32 -1.0, %v3088_v54 }
 0x207   :  { %v3090_v35 = vpop.eup %3089  ;;  %v2542_v0 = vpop.f32.mrf.mxu0  ;;  %v4115_v58 = vsel %vm1127_vm10, %v4073_v34, %v2426_v59 }
 0x208   :  { %v1108_v61 = vmul.f32 1.442695, %v4111_v1  ;;  %v968_v41 = vadd.f32 %v2541_v12, %v4058_v37  ;;  %v1236_v42 = vsel %vm1172_vm11, %v1188_v40, %v2439_v29  ;;  %3103 = vrcp.f32 %v3090_v35  ;;  %v4130_v30 = vpop.f32.mrf.mxu1 }
 0x209   :  { %v3092_v19 = vpop.eup %3091  ;;  %v2543_v10 = vpop.f32.mrf.mxu0  ;;  %1268 = vrot.lane.b32.xlu0 %v1236_v42, %s3246_s25  ;;  %v2427_v50 = vadd.f32 -1.0, %v3090_v35  ;;  %vm1132_vm5 = vcmp.gt.f32.partialorder %v4111_v1, 0.0  ;;  %vm1179_vm11 = vcmp.lt.f32.partialorder %v4099_v51, 0.0 }
 0x20a   :  { %3105 = vpow2.f32 %v1108_v61  ;;  %v4122_v53 = vadd.f32 %v1064_v3, %v968_v41  ;;  %v2544_v46 = vadd.f32 %v2543_v10, %v2542_v0  ;;  %v2440_v28 = vadd.f32 -1.0, %v3092_v19  ;;  %v1077_v17 = vpop.f32.mrf.mxu1 }
 0x20b   :  { %v3094_v43 = vpop.eup %3093  ;;  %v2545_v20 = vpop.f32.mrf.mxu0  ;;  %v4126_v36 = vsel %vm1128_vm12, %v4077_v60, %v2427_v50 }
 0x20c   :  { %v1110_v7 = vmul.f32 1.442695, %v4122_v53  ;;  %v973_v44 = vadd.f32 %v2544_v46, %v4058_v37  ;;  %v1237_v4 = vsel %vm1173_vm13, %v1189_v14, %v2440_v28  ;;  %3107 = vrcp.f32 %v3094_v43  ;;  %v2687_v40 = vpop.f32.mrf.mxu1 }
 0x20d   :  { %v3096_v15 = vpop.eup %3095  ;;  %v2546_v47 = vpop.f32.mrf.mxu0  ;;  %1270 = vrot.lane.b32.xlu1 %v1237_v4, %s3246_s25  ;;  %v2428_v21 = vadd.f32 -1.0, %v3094_v43  ;;  %v1193_v46 = vsub.f32 0.0, %v4081_v2  ;;  %vm1133_vm8 = vcmp.gt.f32.partialorder %v4122_v53, 0.0  ;;  %vm1180_vm13 = vcmp.lt.f32.partialorder %v4111_v1, 0.0 }
 0x20e   :  { %3109 = vpow2.f32 %v1110_v7  ;;  %v4136_v49 = vadd.f32 %v4089_v22, %v973_v44  ;;  %v2547_v32 = vadd.f32 %v2546_v47, %v2545_v20  ;;  %v2441_v56 = vadd.f32 -1.0, %v3096_v15  ;;  %v1080_v14 = vpop.f32.mrf.mxu1 }
 0x20f   :  { %v3098_v23 = vpop.eup %3097  ;;  %v2548_v13 = vpop.f32.mrf.mxu0  ;;  %v4140_v24 = vsel %vm1129_vm14, %v4081_v2, %v2428_v21  ;;  %v1191_v22 = vsub.f32 0.0, %v4073_v34 }
 0x210   :  { %v1112_v38 = vmul.f32 1.442695, %v4136_v49  ;;  %v976_v45 = vadd.f32 %v2547_v32, %v4058_v37  ;;  %v1238_v63 = vsel %vm1174_vm15, %v1190_v31, %v2441_v56  ;;  %3111 = vrcp.f32 %v3098_v23 }
 0x211   :  { %v3100_v18 = vpop.eup %3099  ;;  %v2549_v27 = vpop.f32.mrf.mxu0  ;;  %1272 = vrot.lane.b32.xlu0 %v1238_v63, %s3246_s25  ;;  %v2429_v9 = vadd.f32 -1.0, %v3098_v23  ;;  %v1194_v56 = vsub.f32 0.0, %v4091_v39  ;;  %vm1134_vm10 = vcmp.gt.f32.partialorder %v4136_v49, 0.0  ;;  %vm1181_vm15 = vcmp.lt.f32.partialorder %v4122_v53, 0.0 }
 0x212   :  { %3113 = vpow2.f32 %v1112_v38  ;;  %v4148_v11 = vadd.f32 %v4107_v57, %v976_v45  ;;  %v2550_v55 = vadd.f32 %v2549_v27, %v2548_v13  ;;  %v2442_v48 = vadd.f32 -1.0, %v3100_v18 }
 0x213   :  { %v3102_v25 = vpop.eup %3101  ;;  %v2551_v33 = vpop.f32.mrf.mxu0  ;;  %v4152_v16 = vsel %vm1130_vm1, %v4091_v39, %v2429_v9  ;;  %v1192_v57 = vsub.f32 0.0, %v4077_v60 }
 0x214   :  { %v1114_v26 = vmul.f32 1.442695, %v4148_v11  ;;  %v981_v8 = vadd.f32 %v2550_v55, %v4058_v37  ;;  %v1239_v54 = vsel %vm1175_vm2, %v1191_v22, %v2442_v48  ;;  %3115 = vrcp.f32 %v3102_v25 }
 0x215   :  { %v3104_v62 = vpop.eup %3103  ;;  %v2552_v59 = vpop.f32.mrf.mxu0  ;;  %1274 = vrot.lane.b32.xlu1 %v1239_v54, %s3246_s25  ;;  %v2430_v12 = vadd.f32 -1.0, %v3102_v25  ;;  %v1196_v54 = vsub.f32 0.0, %v4111_v1  ;;  %vm1135_vm12 = vcmp.gt.f32.partialorder %v4148_v11, 0.0  ;;  %vm1182_vm2 = vcmp.lt.f32.partialorder %v4136_v49, 0.0 }
 0x216   :  { %3117 = vpow2.f32 %v1114_v26  ;;  %v4159_v34 = vadd.f32 %v1077_v17, %v981_v8  ;;  %v2553_v29 = vadd.f32 %v2552_v59, %v2551_v33  ;;  %v2443_v35 = vadd.f32 -1.0, %v3104_v62 }
 0x217   :  { %v3106_v0 = vpop.eup %3105  ;;  %v2554_v61 = vpop.f32.mrf.mxu0  ;;  %v4163_v41 = vsel %vm1131_vm3, %v4099_v51, %v2430_v12 }
 0x218   :  { %v1116_v42 = vmul.f32 1.442695, %v4159_v34  ;;  %v984_v19 = vadd.f32 %v2553_v29, %v4058_v37  ;;  %v1240_v3 = vsel %vm1176_vm4, %v1192_v57, %v2443_v35  ;;  %3119 = vrcp.f32 %v3106_v0 }
 0x219   :  { %v3108_v10 = vpop.eup %3107  ;;  %v2555_v50 = vpop.f32.mrf.mxu0  ;;  %1276 = vrot.lane.b32.xlu0 %v1240_v3, %s3246_s25  ;;  %v2431_v28 = vadd.f32 -1.0, %v3106_v0  ;;  %vm1136_vm14 = vcmp.gt.f32.partialorder %v4159_v34, 0.0  ;;  %v1197_v29 = vsub.f32 0.0, %v4122_v53  ;;  %v1198_v3 = vsub.f32 0.0, %v4136_v49 }
 0x21a   :  { %3121 = vpow2.f32 %v1116_v42  ;;  %v4170_v60 = vadd.f32 %v1080_v14, %v984_v19  ;;  %v2556_v43 = vadd.f32 %v2555_v50, %v2554_v61  ;;  %v2444_v20 = vadd.f32 -1.0, %v3108_v10 }
 0x21b   :  { %v3110_v7 = vpop.eup %3109  ;;  %v2557_v44 = vpop.f32.mrf.mxu0  ;;  %v4174_v4 = vsel %vm1132_vm5, %v4111_v1, %v2431_v28  ;;  %vm1183_vm4 = vcmp.lt.f32.partialorder %v4148_v11, 0.0 }
 0x21c   :  { %v1118_v15 = vmul.f32 1.442695, %v4170_v60  ;;  %v989_v47 = vadd.f32 %v2556_v43, %v4058_v37  ;;  %v1241_v31 = vsel %vm1177_vm7, %v1193_v46, %v2444_v20  ;;  %3123 = vrcp.f32 %v3110_v7 }
 0x21d   :  { %v3112_v21 = vpop.eup %3111  ;;  %v2558_v32 = vpop.f32.mrf.mxu0  ;;  %1278 = vrot.lane.b32.xlu1 %v1241_v31, %s3246_s25  ;;  %v2432_v23 = vadd.f32 -1.0, %v3110_v7  ;;  %vm1137_vm1 = vcmp.gt.f32.partialorder %v4170_v60, 0.0  ;;  %v1199_v43 = vsub.f32 0.0, %v4148_v11  ;;  %v1200_v31 = vsub.f32 0.0, %v4159_v34 }
 0x21e   :  { %3125 = vpow2.f32 %v1118_v15  ;;  %v4182_v2 = vadd.f32 %v4130_v30, %v989_v47  ;;  %v2559_v13 = vadd.f32 %v2558_v32, %v2557_v44  ;;  %v2445_v38 = vadd.f32 -1.0, %v3112_v21 }
 0x21f   :  { %v3114_v45 = vpop.eup %3113  ;;  %v4186_v63 = vsel %vm1133_vm8, %v4122_v53, %v2432_v23  ;;  %v1195_v30 = vsub.f32 0.0, %v4099_v51  ;;  %vm1184_vm7 = vcmp.lt.f32.partialorder %v4159_v34, 0.0  ;;  %vm1185_vm8 = vcmp.lt.f32.partialorder %v4170_v60, 0.0 }
 0x220   :  { %v1120_v18 = vmul.f32 1.442695, %v4182_v2  ;;  %v992_v17 = vadd.f32 %v2559_v13, %v4058_v37  ;;  %v1242_v27 = vsel %vm1178_vm9, %v1194_v56, %v2445_v38  ;;  %3127 = vrcp.f32 %v3114_v45 }
 0x221   :  { %v3116_v22 = vpop.eup %3115  ;;  %1280 = vrot.lane.b32.xlu0 %v1242_v27, %s3246_s25  ;;  %v2433_v9 = vadd.f32 -1.0, %v3114_v45  ;;  %vm1138_vm3 = vcmp.gt.f32.partialorder %v4182_v2, 0.0  ;;  %vm1186_vm9 = vcmp.lt.f32.partialorder %v4182_v2, 0.0 }
 0x222   :  { %3129 = vpow2.f32 %v1120_v18  ;;  %v4192_v55 = vadd.f32 %v2687_v40, %v992_v17  ;;  %v2446_v48 = vadd.f32 -1.0, %v3116_v22  ;;  %v1202_v18 = vsub.f32 0.0, %v4182_v2 }
 0x223   :  { %v3118_v39 = vpop.eup %3117  ;;  %v4197_v25 = vsel %vm1134_vm10, %v4136_v49, %v2433_v9 }
 0x224   :  { %v1122_v37 = vmul.f32 1.442695, %v4192_v55  ;;  %v1243_v33 = vsel %vm1179_vm11, %v1195_v30, %v2446_v48  ;;  %3131 = vrcp.f32 %v3118_v39  ;;  %v2434_v8 = vadd.f32 -1.0, %v3118_v39  ;;  %v2993_v48 = vld [vmem:[%s4776_s3 + $0xb8] sm:$0xff]   ;;  %v2994_v39 = vld [vmem:[%s4776_s3 + $0x70] sm:$0xff]  }
 0x225   :  { %v3120_v26 = vpop.eup %3119  ;;  %1282 = vrot.lane.b32.xlu1 %v1243_v33, %s3246_s25  ;;  %vm1139_vm5 = vcmp.gt.f32.partialorder %v4192_v55, 0.0  ;;  %v1203_v22 = vsub.f32 0.0, %v4192_v55  ;;  %vm1187_vm10 = vcmp.lt.f32.partialorder %v4192_v55, 0.0  ;;  %2688 = vmatprep.subr.bf16.mxu0 %v2993_v48  ;;  %v2996_v33 = vld [vmem:[%s4776_s3 + $0x68] sm:$0xff]  }
 0x226   :  { %3133 = vpow2.f32 %v1122_v37  ;;  %v2447_v62 = vadd.f32 -1.0, %v3120_v26  ;;  %v4205_v51 = vsel %vm1135_vm12, %v4148_v11, %v2434_v8  ;;  %v1201_v11 = vsub.f32 0.0, %v4170_v60  ;;  %2689 = vmatpush3.bf16.msra.mxu0 %v2993_v48  ;;  %v2995_v37 = vld [vmem:[%s4776_s3 + $0x30] sm:$0xff]   ;;  %v3003_v26 = vld [vmem:[%s4776_s3 + $0xa8] sm:$0xff]  }
 0x227   :  { %v3122_v40 = vpop.eup %3121  ;;  %v2997_v8 = vld [vmem:[%s4776_s3 + $0x28] sm:$0xff]  }
 0x228   :  { %v1244_v59 = vsel %vm1180_vm13, %v1196_v54, %v2447_v62  ;;  %3135 = vrcp.f32 %v3122_v40  ;;  %v2435_v57 = vadd.f32 -1.0, %v3122_v40  ;;  %v2999_v54 = vld [vmem:[%s4776_s3 + $0x60] sm:$0xff]   ;;  %v3001_v40 = vld [vmem:[%s4776_s3 + $0x58] sm:$0xff]  }
 0x229   :  { %v3124_v12 = vpop.eup %3123  ;;  %1284 = vrot.lane.b32.xlu0 %v1244_v59, %s3246_s25  ;;  %v3000_v62 = vld [vmem:[%s4776_s3 + $0x20] sm:$0xff]   ;;  %v3002_v59 = vld [vmem:[%s4776_s3 + $0x18] sm:$0xff]  }
 0x22a   :  { %v2448_v35 = vadd.f32 -1.0, %v3124_v12  ;;  %v4211_v0 = vsel %vm1136_vm14, %v4159_v34, %v2435_v57  ;;  %v3004_v57 = vld [vmem:[%s4776_s3 + $0x50] sm:$0xff]  }
 0x22b   :  { %v3126_v61 = vpop.eup %3125  ;;  %v3005_v12 = vld [vmem:[%s4776_s3 + $0x10] sm:$0xff]  }
 0x22c   :  { %v1245_v1 = vsel %vm1181_vm15, %v1197_v29, %v2448_v35  ;;  %3137 = vrcp.f32 %v3126_v61  ;;  %v2436_v42 = vadd.f32 -1.0, %v3126_v61  ;;  %v3006_v61 = vld [vmem:[%s4776_s3 + $0x48] sm:$0xff]  }
 0x22d   :  { %v3128_v19 = vpop.eup %3127  ;;  %1286 = vrot.lane.b32.xlu1 %v1245_v1, %s3246_s25  ;;  %v3007_v1 = vld [vmem:[%s4776_s3 + $0x8] sm:$0xff]  }
 0x22e   :  { %v2449_v10 = vadd.f32 -1.0, %v3128_v19  ;;  %v4218_v14 = vsel %vm1137_vm1, %v4170_v60, %v2436_v42  ;;  %v2991_v60 = vld [vmem:[%s4776_s3 + $0x78] sm:$0xff]   ;;  %v3008_v42 = vld [vmem:[%s4776_s3 + $0xa0] sm:$0xff]  }
 0x22f   :  { %v3130_v50 = vpop.eup %3129  ;;  %2576 = vmatprep.subr.bf16.mxu1 %v2991_v60  ;;  %v3009_v19 = vld [vmem:[%s4776_s3 + $0x40] sm:$0xff]  }
 0x230   :  { %v1246_v46 = vsel %vm1182_vm2, %v1198_v3, %v2449_v10  ;;  %3139 = vrcp.f32 %v3130_v50  ;;  %v2437_v53 = vadd.f32 -1.0, %v3130_v50  ;;  %v3010_v3 = vld [vmem:[%s4776_s3] sm:$0xff]  }
 0x231   :  { %v3132_v28 = vpop.eup %3131  ;;  %1288 = vrot.lane.b32.xlu0 %v1246_v46, %s3246_s25  ;;  %v1405_v50 = vld [vmem:[#allocation3 + $0x1] sm:$0xff] }
 0x232   :  { %v2450_v20 = vadd.f32 -1.0, %v3132_v28  ;;  %v4225_v7 = vsel %vm1138_vm3, %v4182_v2, %v2437_v53  ;;  %v2992_v2 = vld [vmem:[%s4776_s3 + $0x38] sm:$0xff]  }
 0x233   :  { %v3134_v44 = vpop.eup %3133  ;;  %2577 = vmatpush3.bf16.msra.mxu1 %v2992_v2 }
 0x234   :  { %v1247_v15 = vsel %vm1183_vm4, %v1199_v43, %v2450_v20  ;;  %3141 = vrcp.f32 %v3134_v44  ;;  %v2438_v49 = vadd.f32 -1.0, %v3134_v44  ;;  %2578 = vmatprep.subr.bf16.mxu1 %v2994_v39 }
 0x235   :  { %v3136_v47 = vpop.eup %3135  ;;  %1290 = vrot.lane.b32.xlu1 %v1247_v15, %s3246_s25 }
 0x236   :  { %v2451_v21 = vadd.f32 -1.0, %v3136_v47  ;;  %v4232_v32 = vsel %vm1139_vm5, %v4192_v55, %v2438_v49  ;;  %v2998_v55 = vld [vmem:[%s4776_s3 + $0xb0] sm:$0xff]  }
 0x237   :  { %2690 = vmatprep.subr.bf16.mxu0 %v2998_v55  ;;  %2579 = vmatpush3.bf16.msra.mxu1 %v2995_v37 }
 0x238   :  { %v1248_v56 = vsel %vm1184_vm7, %v1200_v31, %v2451_v21  ;;  %2691 = vmatpush3.bf16.msra.mxu0 %v2998_v55  ;;  %2580 = vmatprep.subr.bf16.mxu1 %v2996_v33 }
 0x239   :  { %v3138_v23 = vpop.eup %3137  ;;  %1292 = vrot.lane.b32.xlu0 %v1248_v56, %s3246_s25  ;;  %2692 = vmatprep.subr.bf16.mxu0 %v3003_v26 }
 0x23a   :  { %v2452_v13 = vadd.f32 -1.0, %v3138_v23  ;;  %v3012_v23 = vld [vmem:[%s4776_s3 + $0x90] sm:$0xff]  }
 0x23b   :  { %2581 = vmatpush3.bf16.msra.mxu1 %v2997_v8 }
 0x23c   :  { %v1249_v38 = vsel %vm1185_vm8, %v1201_v11, %v2452_v13  ;;  %2693 = vmatpush3.bf16.msra.mxu0 %v3003_v26  ;;  %2582 = vmatprep.subr.bf16.mxu1 %v2999_v54 }
 0x23d   :  { %v3140_v45 = vpop.eup %3139  ;;  %1294 = vrot.lane.b32.xlu1 %v1249_v38, %s3246_s25  ;;  %2694 = vmatprep.subr.bf16.mxu0 %v3008_v42 }
 0x23e   :  { %v2453_v17 = vadd.f32 -1.0, %v3140_v45 }
 0x23f   :  { %2583 = vmatpush3.bf16.msra.mxu1 %v3000_v62  ;;  %v3014_v62 = vld [vmem:[%s4776_s3 + $0x80] sm:$0xff]  }
 0x240   :  { %v1250_v27 = vsel %vm1186_vm9, %v1202_v18, %v2453_v17  ;;  %2584 = vmatprep.subr.bf16.mxu1 %v3001_v40  ;;  %2695 = vmatpush3.bf16.msra.mxu0 %v3008_v42  ;;  %v1413_v40 = vld [vmem:[#allocation3 + $0x91] sm:$0xff] }
 0x241   :  { %v3142_v34 = vpop.eup %3141  ;;  %1296 = vrot.lane.b32.xlu0 %v1250_v27, %s3246_s25 }
 0x242   :  { %v2454_v30 = vadd.f32 -1.0, %v3142_v34 }
 0x243   :  { %2585 = vmatpush3.bf16.msra.mxu1 %v3002_v59 }
 0x244   :  { %v1251_v9 = vsel %vm1187_vm10, %v1203_v22, %v2454_v30  ;;  %2586 = vmatprep.subr.bf16.mxu1 %v3004_v57  ;;  %v3013_v22 = vld [vmem:[%s4776_s3 + $0x88] sm:$0xff]  }
 0x245   :  { %1298 = vrot.lane.b32.xlu1 %v1251_v9, %s3246_s25 }
 0x247   :  { %2587 = vmatpush3.bf16.msra.mxu1 %v3005_v12 }
 0x248   :  { %2588 = vmatprep.subr.bf16.mxu1 %v3006_v61 }
 0x24b   :  { %2589 = vmatpush3.bf16.msra.mxu1 %v3007_v1 }
 0x24c   :  { %2590 = vmatprep.subr.bf16.mxu1 %v3009_v19 }
 0x24f   :  { %2591 = vmatpush3.bf16.msra.mxu1 %v3010_v3 }
 0x27b   :  { %v1269_v29 = vpop.permute.xlu0 %1268 }
 0x27c   :  { %v1316_v35 = vsel %vm262_vm6, %v4085_v6, %v1269_v29 }
 0x27d   :  { %1373 = vst.msk [vmem:[#allocation3 + $0x11] sm:$0xff] %vm279_vm0, %v1316_v35 }
 0x27f   :  { %v1271_v6 = vpop.permute.xlu1 %1270 }
 0x280   :  { %v1317_v10 = vsel %vm262_vm6, %v4095_v5, %v1271_v6  ;;  %v3011_v5 = vld [vmem:[%s4776_s3 + $0x98] sm:$0xff]  }
 0x281   :  { %1374 = vst.msk [vmem:[#allocation3 + $0x21] sm:$0xff] %vm279_vm0, %v1317_v10  ;;  %2696 = vmatprep.subr.bf16.mxu0 %v3011_v5 }
 0x282   :  { %2697 = vmatpush3.bf16.msra.mxu0 %v3011_v5 }
 0x283   :  { %v1273_v46 = vpop.permute.xlu0 %1272  ;;  %2698 = vmatprep.subr.bf16.mxu0 %v3012_v23 }
 0x284   :  { %v1318_v53 = vsel %vm262_vm6, %v4103_v52, %v1273_v46  ;;  %v4313_v28 = vld [vmem:[#allocation3 + $0x11] sm:$0xff] }
 0x285   :  { %1375 = vst.msk [vmem:[#allocation3 + $0x31] sm:$0xff] %vm279_vm0, %v1318_v53  ;;  %v2852_v43 = vpack.i.bf16 %v4313_v28, %v1405_v50  ;;  %v4323_v15 = vld [vmem:[#allocation3 + $0x10] sm:$0xff] }
 0x286   :  { %2699 = vmatpush3.bf16.msra.mxu0 %v3012_v23  ;;  %v4425_v50 = vld [vmem:[#allocation3 + $0x12] sm:$0xff] }
 0x287   :  { %v1275_v20 = vpop.permute.xlu1 %1274  ;;  %2853 = vrot.lane.b32.xlu1 %v2852_v43, %s3247_s1  ;;  %2700 = vmatprep.subr.bf16.mxu0 %v3013_v22 }
 0x288   :  { %v1319_v44 = vsel %vm262_vm6, %v4115_v58, %v1275_v20  ;;  %v4325_v49 = vld [vmem:[#allocation3 + $0x20] sm:$0xff] }
 0x289   :  { %1376 = vst.msk [vmem:[#allocation3 + $0x41] sm:$0xff] %vm279_vm0, %v1319_v44  ;;  %v2847_v52 = vpack.i.bf16 %v4325_v49, %v4323_v15  ;;  %v4333_v21 = vld [vmem:[#allocation3 + $0x21] sm:$0xff] }
 0x28a   :  { %2701 = vmatpush3.bf16.msra.mxu0 %v3013_v22  ;;  %v4419_v3 = vld [vmem:[#allocation3 + $0x22] sm:$0xff] }
 0x28b   :  { %v1277_v47 = vpop.permute.xlu0 %1276  ;;  %2848 = vrot.lane.b32.xlu0 %v2847_v52, %s3247_s1  ;;  %2702 = vmatprep.subr.bf16.mxu0 %v3014_v62  ;;  %v2897_v43 = vpack.i.bf16 %v4419_v3, %v4425_v50 }
 0x28c   :  { %v1320_v31 = vsel %vm262_vm6, %v4126_v36, %v1277_v47  ;;  %v4335_v58 = vld [vmem:[#allocation3 + $0x31] sm:$0xff] }
 0x28d   :  { %1377 = vst.msk [vmem:[#allocation3 + $0x51] sm:$0xff] %vm279_vm0, %v1320_v31  ;;  %v2862_v56 = vpack.i.bf16 %v4335_v58, %v4333_v21  ;;  %v4346_v36 = vld [vmem:[#allocation3 + $0x30] sm:$0xff] }
 0x28e   :  { %2703 = vmatpush3.bf16.msra.mxu0 %v3014_v62 }
 0x28f   :  { %v1279_v11 = vpop.permute.xlu1 %1278  ;;  %2863 = vrot.lane.b32.xlu1 %v2862_v56, %s3247_s1 }
 0x290   :  { %v1321_v13 = vsel %vm262_vm6, %v4140_v24, %v1279_v11  ;;  %v4348_v38 = vld [vmem:[#allocation3 + $0x40] sm:$0xff] }
 0x291   :  { %1378 = vst.msk [vmem:[#allocation3 + $0x61] sm:$0xff] %vm279_vm0, %v1321_v13  ;;  %v2857_v45 = vpack.i.bf16 %v4348_v38, %v4346_v36  ;;  %v4356_v27 = vld [vmem:[#allocation3 + $0x41] sm:$0xff] }
 0x292   :  { %v4403_v29 = vld [vmem:[#allocation3 + $0x42] sm:$0xff] }
 0x293   :  { %v1281_v18 = vpop.permute.xlu0 %1280  ;;  %2858 = vrot.lane.b32.xlu0 %v2857_v45, %s3247_s1 }
 0x294   :  { %v1322_v17 = vsel %vm262_vm6, %v4152_v16, %v1281_v18  ;;  %v4358_v24 = vld [vmem:[#allocation3 + $0x51] sm:$0xff] }
 0x295   :  { %1379 = vst.msk [vmem:[#allocation3 + $0x71] sm:$0xff] %vm279_vm0, %v1322_v17  ;;  %v2872_v34 = vpack.i.bf16 %v4358_v24, %v4356_v27  ;;  %v4369_v16 = vld [vmem:[#allocation3 + $0x50] sm:$0xff] }
 0x296   :  { %v4456_v45 = vld [vmem:[#allocation3 + $0x52] sm:$0xff] }
 0x297   :  { %v1283_v30 = vpop.permute.xlu1 %1282  ;;  %2873 = vrot.lane.b32.xlu1 %v2872_v34, %s3247_s1 }
 0x298   :  { %v1323_v9 = vsel %vm262_vm6, %v4163_v41, %v1283_v30  ;;  %v4371_v60 = vld [vmem:[#allocation3 + $0x60] sm:$0xff] }
 0x299   :  { %1380 = vst.msk [vmem:[#allocation3 + $0x81] sm:$0xff] %vm279_vm0, %v1323_v9  ;;  %v2867_v2 = vpack.i.bf16 %v4371_v60, %v4369_v16  ;;  %v4379_v55 = vld [vmem:[#allocation3 + $0x61] sm:$0xff] }
 0x29a   :  { %v4450_v11 = vld [vmem:[#allocation3 + $0x62] sm:$0xff] }
 0x29b   :  { %v1285_v48 = vpop.permute.xlu0 %1284  ;;  %2868 = vrot.lane.b32.xlu0 %v2867_v2, %s3247_s1  ;;  %v2917_v34 = vpack.i.bf16 %v4450_v11, %v4456_v45 }
 0x29c   :  { %v1324_v39 = vsel %vm262_vm6, %v4174_v4, %v1285_v48  ;;  %v4381_v41 = vld [vmem:[#allocation3 + $0x71] sm:$0xff] }
 0x29d   :  { %1381 = vst.msk [vmem:[#allocation3 + $0xa1] sm:$0xff] %vm279_vm0, %v1324_v39  ;;  %v2882_v37 = vpack.i.bf16 %v4381_v41, %v4379_v55  ;;  %v4389_v8 = vld [vmem:[#allocation3 + $0x70] sm:$0xff] }
 0x29e   :  { %v4444_v31 = vld [vmem:[#allocation3 + $0x72] sm:$0xff] }
 0x29f   :  { %v1287_v33 = vpop.permute.xlu1 %1286  ;;  %2883 = vrot.lane.b32.xlu1 %v2882_v37, %s3247_s1 }
 0x2a0   :  { %v1325_v26 = vsel %vm262_vm6, %v4186_v63, %v1287_v33  ;;  %v1444_v54 = vld [vmem:[#allocation3 + $0x80] sm:$0xff] }
 0x2a1   :  { %1382 = vst.msk [vmem:[#allocation3 + $0xb1] sm:$0xff] %vm279_vm0, %v1325_v26  ;;  %v2877_v4 = vpack.i.bf16 %v1444_v54, %v4389_v8  ;;  %v1476_v20 = vld [vmem:[#allocation3 + $0x82] sm:$0xff] }
 0x2a2   :  { %v2922_v23 = vpack.i.bf16 %v1476_v20, %v4444_v31 }
 0x2a3   :  { %v1289_v59 = vpop.permute.xlu0 %1288  ;;  %2878 = vrot.lane.b32.xlu0 %v2877_v4, %s3247_s1 }
 0x2a4   :  { %v1326_v57 = vsel %vm262_vm6, %v4197_v25, %v1289_v59  ;;  %v4399_v63 = vld [vmem:[#allocation3 + $0xa1] sm:$0xff]  ;;  %v4412_v25 = vld [vmem:[#allocation3 + $0x32] sm:$0xff] }
 0x2a5   :  { %1383 = vst.msk [vmem:[#allocation3 + $0xc1] sm:$0xff] %vm279_vm0, %v1326_v57  ;;  %v2887_v12 = vpack.i.bf16 %v4399_v63, %v1413_v40  ;;  %v4408_v1 = vld [vmem:[#allocation3 + $0xa0] sm:$0xff]  ;;  %v2902_v6 = vpack.i.bf16 %v4403_v29, %v4412_v25 }
 0x2a7   :  { %v1291_v35 = vpop.permute.xlu1 %1290  ;;  %2888 = vrot.lane.b32.xlu1 %v2887_v12, %s3247_s1 }
 0x2a8   :  { %v1327_v61 = vsel %vm262_vm6, %v4205_v51, %v1291_v35  ;;  %v4410_v42 = vld [vmem:[#allocation3 + $0xb0] sm:$0xff] }
 0x2a9   :  { %1384 = vst.msk [vmem:[#allocation3 + $0xd1] sm:$0xff] %vm279_vm0, %v1327_v61  ;;  %v2892_v19 = vpack.i.bf16 %v4410_v42, %v4408_v1  ;;  %v4427_v46 = vld [vmem:[#allocation3 + $0xb1] sm:$0xff] }
 0x2aa   :  { %v4484_v26 = vld [vmem:[#allocation3 + $0xb2] sm:$0xff] }
 0x2ab   :  { %v1293_v10 = vpop.permute.xlu0 %1292  ;;  %2893 = vrot.lane.b32.xlu0 %v2892_v19, %s3247_s1  ;;  %2903 = vrot.lane.b32.xlu1 %v2902_v6, %s3247_s1 }
 0x2ac   :  { %v1328_v51 = vsel %vm262_vm6, %v4211_v0, %v1293_v10  ;;  %v4429_v53 = vld [vmem:[#allocation3 + $0xc1] sm:$0xff] }
 0x2ad   :  { %1385 = vst.msk [vmem:[#allocation3 + $0xe1] sm:$0xff] %vm279_vm0, %v1328_v51  ;;  %v2907_v5 = vpack.i.bf16 %v4429_v53, %v4427_v46  ;;  %v4440_v52 = vld [vmem:[#allocation3 + $0xc0] sm:$0xff] }
 0x2ae   :  { %v4477_v39 = vld [vmem:[#allocation3 + $0xc2] sm:$0xff] }
 0x2af   :  { %v1295_v44 = vpop.permute.xlu1 %1294  ;;  %2898 = vrot.lane.b32.xlu0 %v2897_v43, %s3247_s1  ;;  %2908 = vrot.lane.b32.xlu1 %v2907_v5, %s3247_s1 }
 0x2b0   :  { %v1329_v0 = vsel %vm262_vm6, %v4218_v14, %v1295_v44  ;;  %v4442_v47 = vld [vmem:[#allocation3 + $0xd0] sm:$0xff]  ;;  %v1389_v44 = vld [vmem:[#allocation3] sm:$0xff] }
 0x2b1   :  { %1386 = vst.msk [vmem:[#allocation3 + $0xf1] sm:$0xff] %vm279_vm0, %v1329_v0  ;;  %v2912_v56 = vpack.i.bf16 %v4442_v47, %v4440_v52  ;;  %v4458_v18 = vld [vmem:[#allocation3 + $0xd1] sm:$0xff] }
 0x2b2   :  { %v4467_v30 = vld [vmem:[#allocation3 + $0xd2] sm:$0xff] }
 0x2b3   :  { %v1297_v13 = vpop.permute.xlu0 %1296  ;;  %2913 = vrot.lane.b32.xlu0 %v2912_v56, %s3247_s1  ;;  %2923 = vrot.lane.b32.xlu1 %v2922_v23, %s3247_s1  ;;  %v2942_v33 = vpack.i.bf16 %v4467_v30, %v4477_v39  ;;  %v1421_v56 = vld [vmem:[#allocation3 + $0x2] sm:$0xff] }
 0x2b4   :  { %v1330_v14 = vsel %vm262_vm6, %v4225_v7, %v1297_v13  ;;  %v4460_v17 = vld [vmem:[#allocation3 + $0xe1] sm:$0xff] }
 0x2b5   :  { %1387 = vst.msk [vmem:[#allocation3 + $0x101] sm:$0xff] %vm279_vm0, %v1330_v14  ;;  %v2927_v22 = vpack.i.bf16 %v4460_v17, %v4458_v18  ;;  %v4473_v2 = vld [vmem:[#allocation3 + $0xe0] sm:$0xff] }
 0x2b6   :  { %v4510_v10 = vld [vmem:[#allocation3 + $0xe2] sm:$0xff] }
 0x2b7   :  { %v1299_v9 = vpop.permute.xlu1 %1298  ;;  %2918 = vrot.lane.b32.xlu0 %v2917_v34, %s3247_s1  ;;  %2928 = vrot.lane.b32.xlu1 %v2927_v22, %s3247_s1 }
 0x2b8   :  { %v1331_v7 = vsel %vm262_vm6, %v4232_v32, %v1299_v9  ;;  %v4475_v48 = vld [vmem:[#allocation3 + $0xf0] sm:$0xff]  ;;  %v4488_v32 = vld [vmem:[#allocation3 + $0xa2] sm:$0xff] }
 0x2b9   :  { %1388 = vst.msk [vmem:[#allocation3 + $0x111] sm:$0xff] %vm279_vm0, %v1331_v7  ;;  %v2932_v37 = vpack.i.bf16 %v4475_v48, %v4473_v2  ;;  %v4490_v54 = vld [vmem:[#allocation3 + $0xf1] sm:$0xff]  ;;  %v2937_v62 = vpack.i.bf16 %v4484_v26, %v4488_v32 }
 0x2ba   :  { %v4506_v6 = vld [vmem:[#allocation3 + $0xf2] sm:$0xff] }
 0x2bb   :  { %2933 = vrot.lane.b32.xlu0 %v2932_v37, %s3247_s1  ;;  %2943 = vrot.lane.b32.xlu1 %v2942_v33, %s3247_s1  ;;  %v2957_v51 = vpack.i.bf16 %v4506_v6, %v4510_v10 }
 0x2bc   :  { %v4492_v4 = vld [vmem:[#allocation3 + $0x101] sm:$0xff] }
 0x2bd   :  { %v2947_v40 = vpack.i.bf16 %v4492_v4, %v4490_v54  ;;  %v4500_v59 = vld [vmem:[#allocation3 + $0x100] sm:$0xff] }
 0x2be   :  { %v4502_v12 = vld [vmem:[#allocation3 + $0x102] sm:$0xff] }
 0x2bf   :  { %2938 = vrot.lane.b32.xlu0 %v2937_v62, %s3247_s1  ;;  %2948 = vrot.lane.b32.xlu1 %v2947_v40, %s3247_s1 }
 0x2c0   :  { %v1452_v57 = vld [vmem:[#allocation3 + $0x110] sm:$0xff] }
 0x2c1   :  { %v1484_v35 = vld [vmem:[#allocation3 + $0x112] sm:$0xff]  ;;  %v2952_v61 = vpack.i.bf16 %v1452_v57, %v4500_v59 }
 0x2c2   :  { %v2962_v19 = vpack.i.bf16 %v1484_v35, %v4502_v12 }
 0x2c3   :  { %2953 = vrot.lane.b32.xlu0 %v2952_v61, %s3247_s1 }
 0x2c4   :  { %2963 = vrot.lane.b32.xlu1 %v2962_v19, %s3247_s1 }
 0x2c7   :  { %2958 = vrot.lane.b32.xlu0 %v2957_v51, %s3247_s1 }
 0x2f9   :  { %v2854_v43 = vpop.permute.xlu1 %2853 }
 0x2fa   :  { %v2856_v5 = vunpack.i.h.bf16 %v2854_v43  ;;  %v2855_v20 = vunpack.i.l.bf16 %v2854_v43 }
 0x2fc   :  { %v1677_v14 = vsel %vm279_vm0, %v1389_v44, %v2855_v20  ;;  %v1678_v34 = vsel %vm279_vm0, %v4323_v15, %v2856_v5 }
 0x2fd   :  { %v2849_v0 = vpop.permute.xlu0 %2848  ;;  %v1725_v33 = vpack.c.bf16 %v1678_v34, %v1677_v14 }
 0x2fe   :  { %v2851_v23 = vunpack.i.h.bf16 %v2849_v0  ;;  %v2850_v13 = vunpack.i.l.bf16 %v2849_v0 }
 0x300   :  { %v1693_v22 = vsel %vm279_vm0, %v1421_v56, %v2850_v13  ;;  %v1694_v9 = vsel %vm279_vm0, %v4425_v50, %v2851_v23 }
 0x301   :  { %v2864_v7 = vpop.permute.xlu1 %2863  ;;  %v1726_v37 = vpack.c.bf16 %v1694_v9, %v1693_v22 }
 0x302   :  { %v2866_v62 = vunpack.i.h.bf16 %v2864_v7  ;;  %v2865_v40 = vunpack.i.l.bf16 %v2864_v7 }
 0x303   :  { %1980 = vmatprep.mubr.bf16.mxu1 %v1726_v37 }
 0x304   :  { %1981 = vmatmul.mubr.bf16.vlgmr.msra.gmra.mxu1 %v1725_v33  ;;  %v1679_v19 = vsel %vm279_vm0, %v4325_v49, %v2865_v40  ;;  %v1680_v15 = vsel %vm279_vm0, %v4346_v36, %v2866_v62 }
 0x305   :  { %v2859_v57 = vpop.permute.xlu0 %2858  ;;  %v1728_v20 = vpack.c.bf16 %v1680_v15, %v1679_v19  ;;  %v1397_v15 = vld [vmem:[#allocation3 + $0x90] sm:$0xff] }
 0x306   :  { %v2861_v35 = vunpack.i.h.bf16 %v2859_v57  ;;  %v2860_v61 = vunpack.i.l.bf16 %v2859_v57 }
 0x308   :  { %v1695_v51 = vsel %vm279_vm0, %v4419_v3, %v2860_v61  ;;  %v1696_v50 = vsel %vm279_vm0, %v4412_v25, %v2861_v35 }
 0x309   :  { %v2874_v43 = vpop.permute.xlu1 %2873  ;;  %v1729_v5 = vpack.c.bf16 %v1696_v50, %v1695_v51 }
 0x30a   :  { %v2876_v44 = vunpack.i.h.bf16 %v2874_v43  ;;  %v2875_v0 = vunpack.i.l.bf16 %v2874_v43 }
 0x30b   :  { %1988 = vmatprep.mubr.bf16.mxu1 %v1729_v5 }
 0x30c   :  { %1989 = vmatmul.mubr.bf16.gmra.mxu1 %v1728_v20  ;;  %v1681_v49 = vsel %vm279_vm0, %v4348_v38, %v2875_v0  ;;  %v1682_v36 = vsel %vm279_vm0, %v4369_v16, %v2876_v44 }
 0x30d   :  { %v2869_v56 = vpop.permute.xlu0 %2868  ;;  %v1731_v22 = vpack.c.bf16 %v1682_v36, %v1681_v49 }
 0x30e   :  { %v2871_v23 = vunpack.i.h.bf16 %v2869_v56  ;;  %v2870_v13 = vunpack.i.l.bf16 %v2869_v56 }
 0x310   :  { %v1697_v3 = vsel %vm279_vm0, %v4403_v29, %v2870_v13  ;;  %v1698_v25 = vsel %vm279_vm0, %v4456_v45, %v2871_v23 }
 0x311   :  { %v2884_v14 = vpop.permute.xlu1 %2883  ;;  %v1732_v34 = vpack.c.bf16 %v1698_v25, %v1697_v3 }
 0x312   :  { %v2886_v9 = vunpack.i.h.bf16 %v2884_v14  ;;  %v2885_v7 = vunpack.i.l.bf16 %v2884_v14 }
 0x313   :  { %1996 = vmatprep.mubr.bf16.mxu1 %v1732_v34 }
 0x314   :  { %1997 = vmatmul.mubr.bf16.gmra.mxu1 %v1731_v22  ;;  %v1683_v38 = vsel %vm279_vm0, %v4371_v60, %v2885_v7  ;;  %v1684_v16 = vsel %vm279_vm0, %v4389_v8, %v2886_v9  ;;  %v1429_v60 = vld [vmem:[#allocation3 + $0x92] sm:$0xff] }
 0x315   :  { %v2879_v37 = vpop.permute.xlu0 %2878  ;;  %v1734_v35 = vpack.c.bf16 %v1684_v16, %v1683_v38 }
 0x316   :  { %v2881_v33 = vunpack.i.h.bf16 %v2879_v37  ;;  %v2880_v62 = vunpack.i.l.bf16 %v2879_v37 }
 0x318   :  { %v1699_v29 = vsel %vm279_vm0, %v4450_v11, %v2880_v62  ;;  %v1700_v45 = vsel %vm279_vm0, %v4444_v31, %v2881_v33 }
 0x319   :  { %v2889_v40 = vpop.permute.xlu1 %2888  ;;  %v1735_v57 = vpack.c.bf16 %v1700_v45, %v1699_v29 }
 0x31a   :  { %v2891_v61 = vunpack.i.h.bf16 %v2889_v40  ;;  %v2890_v19 = vunpack.i.l.bf16 %v2889_v40 }
 0x31b   :  { %2004 = vmatprep.mubr.bf16.mxu1 %v1735_v57 }
 0x31c   :  { %2005 = vmatmul.mubr.bf16.gmra.mxu1 %v1734_v35  ;;  %v1685_v11 = vsel %vm279_vm0, %v1397_v15, %v2890_v19  ;;  %v1686_v31 = vsel %vm279_vm0, %v4408_v1, %v2891_v61  ;;  %v1460_v15 = vld [vmem:[#allocation3 + $0x81] sm:$0xff] }
 0x31d   :  { %v2894_v51 = vpop.permute.xlu0 %2893  ;;  %v2904_v50 = vpop.permute.xlu1 %2903  ;;  %v1737_v3 = vpack.c.bf16 %v1686_v31, %v1685_v11 }
 0x31e   :  { %v2896_v43 = vunpack.i.h.bf16 %v2894_v51  ;;  %v2895_v5 = vunpack.i.l.bf16 %v2894_v51  ;;  %v2906_v8 = vunpack.i.h.bf16 %v2904_v50  ;;  %v2905_v20 = vunpack.i.l.bf16 %v2904_v50 }
 0x320   :  { %v1701_v44 = vsel %vm279_vm0, %v1429_v60, %v2895_v5  ;;  %v1702_v0 = vsel %vm279_vm0, %v4488_v32, %v2896_v43  ;;  %v1712_v25 = vsel %vm279_vm0, %v4356_v27, %v2906_v8  ;;  %v1711_v14 = vsel %vm279_vm0, %v4335_v58, %v2905_v20 }
 0x321   :  { %v2899_v56 = vpop.permute.xlu0 %2898  ;;  %v2909_v23 = vpop.permute.xlu1 %2908  ;;  %v1738_v13 = vpack.c.bf16 %v1702_v0, %v1701_v44  ;;  %v1730_v33 = vpack.c.bf16 %v1712_v25, %v1711_v14 }
 0x322   :  { %v2901_v49 = vunpack.i.h.bf16 %v2899_v56  ;;  %v2900_v36 = vunpack.i.l.bf16 %v2899_v56  ;;  %v2911_v34 = vunpack.i.h.bf16 %v2909_v23  ;;  %v2910_v22 = vunpack.i.l.bf16 %v2909_v23 }
 0x323   :  { %2012 = vmatprep.mubr.bf16.mxu1 %v1738_v13 }
 0x324   :  { %2013 = vmatmul.mubr.bf16.gmra.mxu1 %v1737_v3  ;;  %v1709_v1 = vsel %vm279_vm0, %v4313_v28, %v2900_v36  ;;  %v1710_v32 = vsel %vm279_vm0, %v4333_v21, %v2901_v49  ;;  %v1687_v58 = vsel %vm279_vm0, %v4410_v42, %v2910_v22  ;;  %v1688_v29 = vsel %vm279_vm0, %v4440_v52, %v2911_v34 }
 0x325   :  { %v2914_v9 = vpop.permute.xlu0 %2913  ;;  %v2924_v7 = vpop.permute.xlu1 %2923  ;;  %v1727_v37 = vpack.c.bf16 %v1710_v32, %v1709_v1  ;;  %v1740_v19 = vpack.c.bf16 %v1688_v29, %v1687_v58  ;;  %v1468_v29 = vld [vmem:[#allocation3 + $0x111] sm:$0xff] }
 0x326   :  { %v2916_v62 = vunpack.i.h.bf16 %v2914_v9  ;;  %v2915_v38 = vunpack.i.l.bf16 %v2914_v9  ;;  %v2926_v27 = vunpack.i.h.bf16 %v2924_v7  ;;  %v2925_v16 = vunpack.i.l.bf16 %v2924_v7 }
 0x327   :  { %2704 = vmatprep.mubr.bf16.mxu0 %v1727_v37 }
 0x328   :  { %2705 = vmatmul.mubr.bf16.vlgmr.msra.gmra.mxu0 %v1730_v33  ;;  %v1703_v28 = vsel %vm279_vm0, %v4484_v26, %v2915_v38  ;;  %v1704_v21 = vsel %vm279_vm0, %v4477_v39, %v2916_v62  ;;  %v1715_v42 = vsel %vm279_vm0, %v4381_v41, %v2925_v16  ;;  %v1716_v52 = vsel %vm279_vm0, %v1460_v15, %v2926_v27 }
 0x329   :  { %v2919_v45 = vpop.permute.xlu0 %2918  ;;  %v2929_v40 = vpop.permute.xlu1 %2928  ;;  %v1741_v57 = vpack.c.bf16 %v1704_v21, %v1703_v28  ;;  %v1736_v11 = vpack.c.bf16 %v1716_v52, %v1715_v42 }
 0x32a   :  { %v2921_v35 = vunpack.i.h.bf16 %v2919_v45  ;;  %v2920_v61 = vunpack.i.l.bf16 %v2919_v45  ;;  %v2931_v51 = vunpack.i.h.bf16 %v2929_v40  ;;  %v2930_v50 = vunpack.i.l.bf16 %v2929_v40 }
 0x32b   :  { %2020 = vmatprep.mubr.bf16.mxu1 %v1741_v57 }
 0x32c   :  { %2021 = vmatmul.mubr.bf16.gmra.mxu1 %v1740_v19  ;;  %v1713_v26 = vsel %vm279_vm0, %v4358_v24, %v2920_v61  ;;  %v1714_v39 = vsel %vm279_vm0, %v4379_v55, %v2921_v35  ;;  %v1689_v41 = vsel %vm279_vm0, %v4442_v47, %v2930_v50  ;;  %v1690_v0 = vsel %vm279_vm0, %v4473_v2, %v2931_v51 }
 0x32d   :  { %v2934_v60 = vpop.permute.xlu0 %2933  ;;  %v2944_v43 = vpop.permute.xlu1 %2943  ;;  %v1733_v5 = vpack.c.bf16 %v1714_v39, %v1713_v26  ;;  %v1743_v3 = vpack.c.bf16 %v1690_v0, %v1689_v41 }
 0x32e   :  { %v2936_v8 = vunpack.i.h.bf16 %v2934_v60  ;;  %v2935_v20 = vunpack.i.l.bf16 %v2934_v60  ;;  %v2946_v31 = vunpack.i.h.bf16 %v2944_v43  ;;  %v2945_v44 = vunpack.i.l.bf16 %v2944_v43 }
 0x32f   :  { %2708 = vmatprep.mubr.bf16.mxu0 %v1733_v5 }
 0x330   :  { %2709 = vmatmul.mubr.bf16.gmra.mxu0 %v1736_v11  ;;  %v1705_v24 = vsel %vm279_vm0, %v4467_v30, %v2935_v20  ;;  %v1706_v55 = vsel %vm279_vm0, %v4510_v10, %v2936_v8  ;;  %v1719_v47 = vsel %vm279_vm0, %v4429_v53, %v2945_v44  ;;  %v1720_v2 = vsel %vm279_vm0, %v4458_v18, %v2946_v31  ;;  %v4608_v20 = vld [vmem:[%s4777_s4] ss:$0 sm:$0xff]  ;;  %s3248_s4 = smov 96  }
 0x331   :  { %v2939_v56 = vpop.permute.xlu0 %2938  ;;  %v2949_v23 = vpop.permute.xlu1 %2948  ;;  %v1744_v13 = vpack.c.bf16 %v1706_v55, %v1705_v24  ;;  %v1742_v7 = vpack.c.bf16 %v1720_v2, %v1719_v47 }
 0x332   :  { %v2941_v49 = vunpack.i.h.bf16 %v2939_v56  ;;  %v2940_v36 = vunpack.i.l.bf16 %v2939_v56  ;;  %v2951_v25 = vunpack.i.h.bf16 %v2949_v23  ;;  %v2950_v14 = vunpack.i.l.bf16 %v2949_v23 }
 0x333   :  { %2028 = vmatprep.mubr.bf16.mxu1 %v1744_v13 }
 0x334   :  { %2029 = vmatmul.mubr.bf16.gmra.mxu1 %v1743_v3  ;;  %v1717_v30 = vsel %vm279_vm0, %v4399_v63, %v2940_v36  ;;  %v1718_v10 = vsel %vm279_vm0, %v4427_v46, %v2941_v49  ;;  %v1691_v53 = vsel %vm279_vm0, %v4475_v48, %v2950_v14  ;;  %v1692_v18 = vsel %vm279_vm0, %v4500_v59, %v2951_v25 }
 0x335   :  { %v2954_v34 = vpop.permute.xlu0 %2953  ;;  %v1739_v1 = vpack.c.bf16 %v1718_v10, %v1717_v30  ;;  %v1746_v58 = vpack.c.bf16 %v1692_v18, %v1691_v53 }
 0x336   :  { %v2964_v22 = vpop.permute.xlu1 %2963  ;;  %v2956_v32 = vunpack.i.h.bf16 %v2954_v34  ;;  %v2955_v9 = vunpack.i.l.bf16 %v2954_v34 }
 0x337   :  { %v2966_v37 = vunpack.i.h.bf16 %v2964_v22  ;;  %v2965_v33 = vunpack.i.l.bf16 %v2964_v22  ;;  %2712 = vmatprep.mubr.bf16.mxu0 %v1739_v1 }
 0x338   :  { %2713 = vmatmul.mubr.bf16.gmra.mxu0 %v1742_v7  ;;  %v1707_v63 = vsel %vm279_vm0, %v4506_v6, %v2955_v9  ;;  %v1708_v46 = vsel %vm279_vm0, %v4502_v12, %v2956_v32 }
 0x339   :  { %v2959_v62 = vpop.permute.xlu0 %2958  ;;  %v1747_v38 = vpack.c.bf16 %v1708_v46, %v1707_v63  ;;  %v1723_v48 = vsel %vm279_vm0, %v4492_v4, %v2965_v33  ;;  %v1724_v28 = vsel %vm279_vm0, %v1468_v29, %v2966_v37 }
 0x33a   :  { %v2961_v27 = vunpack.i.h.bf16 %v2959_v62  ;;  %v2960_v16 = vunpack.i.l.bf16 %v2959_v62  ;;  %v1748_v21 = vpack.c.bf16 %v1724_v28, %v1723_v48 }
 0x33b   :  { %2036 = vmatprep.mubr.bf16.mxu1 %v1747_v38 }
 0x33c   :  { %2037 = vmatmul.mubr.bf16.gmra.mxu1 %v1746_v58  ;;  %v1721_v59 = vsel %vm279_vm0, %v4460_v17, %v2960_v16  ;;  %v1722_v6 = vsel %vm279_vm0, %v4490_v54, %v2961_v27 }
 0x33d   :  { %v1745_v12 = vpack.c.bf16 %v1722_v6, %v1721_v59 }
 0x33f   :  { %2716 = vmatprep.mubr.bf16.mxu0 %v1745_v12 }
 0x340   :  { %2717 = vmatmul.mubr.bf16.gmra.mxu0 %v1748_v21 }
 0x3c4   :  { %v2592_v45 = vpop.f32.mrf.mxu1 }
 0x3c6   :  { %v2593_v40 = vpop.f32.mrf.mxu1 }
 0x3c7   :  { %v2594_v5 = vadd.f32 %v2593_v40, %v2592_v45 }
 0x3c8   :  { %v2595_v57 = vpop.f32.mrf.mxu1 }
 0x3c9   :  { %v1983_v55 = vadd.f32 %v2594_v5, %v4608_v20 }
 0x3ca   :  { %v2596_v35 = vpop.f32.mrf.mxu1 }
 0x3cb   :  { %v2597_v44 = vadd.f32 %v2596_v35, %v2595_v57 }
 0x3cc   :  { %v2598_v61 = vpop.f32.mrf.mxu1 }
 0x3cd   :  { %v1986_v47 = vadd.f32 %v2597_v44, %v4608_v20 }
 0x3ce   :  { %v2599_v19 = vpop.f32.mrf.mxu1 }
 0x3cf   :  { %v2600_v60 = vadd.f32 %v2599_v19, %v2598_v61 }
 0x3d0   :  { %v2601_v4 = vpop.f32.mrf.mxu1 }
 0x3d1   :  { %v1991_v31 = vadd.f32 %v2600_v60, %v4608_v20 }
 0x3d2   :  { %v2602_v15 = vpop.f32.mrf.mxu1 }
 0x3d3   :  { %v2603_v11 = vadd.f32 %v2602_v15, %v2601_v4 }
 0x3d4   :  { %v2604_v51 = vpop.f32.mrf.mxu1 }
 0x3d5   :  { %v1994_v3 = vadd.f32 %v2603_v11, %v4608_v20 }
 0x3d6   :  { %v2605_v50 = vpop.f32.mrf.mxu1 }
 0x3d7   :  { %v2606_v2 = vadd.f32 %v2605_v50, %v2604_v51 }
 0x3d8   :  { %v2607_v42 = vpop.f32.mrf.mxu1 }
 0x3d9   :  { %v1999_v46 = vadd.f32 %v2606_v2, %v4608_v20 }
 0x3da   :  { %v2608_v52 = vpop.f32.mrf.mxu1 }
 0x3db   :  { %v2609_v53 = vadd.f32 %v2608_v52, %v2607_v42 }
 0x3dc   :  { %v2610_v17 = vpop.f32.mrf.mxu1 }
 0x3dd   :  { %v2002_v12 = vadd.f32 %v2609_v53, %v4608_v20 }
 0x3de   :  { %v2611_v26 = vpop.f32.mrf.mxu1 }
 0x3df   :  { %v2612_v56 = vadd.f32 %v2611_v26, %v2610_v17 }
 0x3e0   :  { %v2613_v39 = vpop.f32.mrf.mxu1 }
 0x3e1   :  { %v2007_v1 = vadd.f32 %v2612_v56, %v4608_v20 }
 0x3e2   :  { %v2614_v54 = vpop.f32.mrf.mxu1 }
 0x3e3   :  { %v2615_v32 = vadd.f32 %v2614_v54, %v2613_v39 }
 0x3e4   :  { %v2616_v43 = vpop.f32.mrf.mxu1 }
 0x3e5   :  { %v2010_v29 = vadd.f32 %v2615_v32, %v4608_v20 }
 0x3e6   :  { %v2617_v8 = vpop.f32.mrf.mxu1 }
 0x3e7   :  { %v2618_v21 = vadd.f32 %v2617_v8, %v2616_v43 }
 0x3e8   :  { %v2619_v41 = vpop.f32.mrf.mxu1  ;;  %v2706_v0 = vpop.f32.mrf.mxu0 }
 0x3e9   :  { %v4611_v24 = vadd.f32 %v2706_v0, %v1991_v31  ;;  %v2015_v26 = vadd.f32 %v2618_v21, %v4608_v20 }
 0x3ea   :  { %v2620_v23 = vpop.f32.mrf.mxu1  ;;  %v2079_v13 = vpop.f32.mrf.mxu0 }
 0x3eb   :  { %v2482_v49 = vmul.f32 -1.442695, %v4611_v24  ;;  %v4615_v36 = vadd.f32 %v2079_v13, %v1983_v55  ;;  %v2621_v52 = vadd.f32 %v2620_v23, %v2619_v41 }
 0x3ec   :  { %v2622_v25 = vpop.f32.mrf.mxu1  ;;  %v2707_v14 = vpop.f32.mrf.mxu0 }
 0x3ed   :  { %3143 = vpow2.f32 %v2482_v49  ;;  %v2480_v30 = vmul.f32 -1.442695, %v4615_v36  ;;  %v4620_v10 = vadd.f32 %v2707_v14, %v1994_v3  ;;  %v2018_v23 = vadd.f32 %v2621_v52, %v4608_v20 }
 0x3ee   :  { %v2623_v34 = vpop.f32.mrf.mxu1  ;;  %v2082_v22 = vpop.f32.mrf.mxu0 }
 0x3ef   :  { %3145 = vpow2.f32 %v2480_v30  ;;  %v2483_v9 = vmul.f32 -1.442695, %v4620_v10  ;;  %v4624_v7 = vadd.f32 %v2082_v22, %v1986_v47  ;;  %v2624_v62 = vadd.f32 %v2623_v34, %v2622_v25 }
 0x3f0   :  { %v2625_v37 = vpop.f32.mrf.mxu1  ;;  %v2710_v33 = vpop.f32.mrf.mxu0 }
 0x3f1   :  { %v2481_v18 = vmul.f32 -1.442695, %v4624_v7  ;;  %v4627_v63 = vadd.f32 %v2710_v33, %v2007_v1  ;;  %3147 = vpow2.f32 %v2483_v9  ;;  %v2023_v57 = vadd.f32 %v2624_v62, %v4608_v20 }
 0x3f2   :  { %v2626_v38 = vpop.f32.mrf.mxu1  ;;  %v2095_v27 = vpop.f32.mrf.mxu0 }
 0x3f3   :  { %3149 = vpow2.f32 %v2481_v18  ;;  %v2486_v16 = vmul.f32 -1.442695, %v4627_v63  ;;  %v4631_v58 = vadd.f32 %v2095_v27, %v1999_v46  ;;  %v2627_v35 = vadd.f32 %v2626_v38, %v2625_v37 }
 0x3f4   :  { %v2628_v48 = vpop.f32.mrf.mxu1  ;;  %v2711_v28 = vpop.f32.mrf.mxu0 }
 0x3f5   :  { %3151 = vpow2.f32 %v2486_v16  ;;  %v2484_v59 = vmul.f32 -1.442695, %v4631_v58  ;;  %v4635_v6 = vadd.f32 %v2711_v28, %v2010_v29  ;;  %v2026_v60 = vadd.f32 %v2627_v35, %v4608_v20 }
 0x3f6   :  { %v2629_v45 = vpop.f32.mrf.mxu1  ;;  %v2098_v40 = vpop.f32.mrf.mxu0 }
 0x3f7   :  { %3153 = vpow2.f32 %v2484_v59  ;;  %v2487_v61 = vmul.f32 -1.442695, %v4635_v6  ;;  %v4640_v19 = vadd.f32 %v2098_v40, %v2002_v12  ;;  %v2630_v41 = vadd.f32 %v2629_v45, %v2628_v48 }
 0x3f8   :  { %v2631_v4 = vpop.f32.mrf.mxu1  ;;  %v2714_v15 = vpop.f32.mrf.mxu0 }
 0x3f9   :  { %v2485_v51 = vmul.f32 -1.442695, %v4640_v19  ;;  %v4643_v50 = vadd.f32 %v2714_v15, %v2023_v57  ;;  %3155 = vpow2.f32 %v2487_v61  ;;  %v2031_v53 = vadd.f32 %v2630_v41, %v4608_v20 }
 0x3fa   :  { %v3144_v42 = vpop.eup %3143  ;;  %v2632_v17 = vpop.f32.mrf.mxu1 }
 0x3fb   :  { %v2111_v39 = vpop.f32.mrf.mxu0  ;;  %3157 = vpow2.f32 %v2485_v51  ;;  %v2490_v54 = vmul.f32 -1.442695, %v4643_v50  ;;  %v2192_v31 = vadd.f32 1.0, %v3144_v42  ;;  %v2633_v22 = vadd.f32 %v2632_v17, %v2631_v4 }
 0x3fc   :  { %v3146_v43 = vpop.eup %3145  ;;  %v4648_v5 = vadd.f32 %v2111_v39, %v2015_v26  ;;  %v2634_v8 = vpop.f32.mrf.mxu1 }
 0x3fd   :  { %v2715_v11 = vpop.f32.mrf.mxu0  ;;  %v2190_v44 = vadd.f32 1.0, %v3146_v43  ;;  %3159 = vpow2.f32 %v2490_v54  ;;  %v2034_v12 = vadd.f32 %v2633_v22, %v4608_v20 }
 0x3fe   :  { %v4650_v0 = vadd.f32 %v2715_v11, %v2026_v60  ;;  %v2488_v55 = vmul.f32 -1.442695, %v4648_v5  ;;  %v2635_v56 = vpop.f32.mrf.mxu1  ;;  %v3148_v49 = vpop.eup %3147 }
 0x3ff   :  { %v2114_v13 = vpop.f32.mrf.mxu0  ;;  %3161 = vrcp.f32 %v2190_v44  ;;  %v2636_v25 = vadd.f32 %v2635_v56, %v2634_v8  ;;  %v2193_v9 = vadd.f32 1.0, %v3148_v49 }
 0x400   :  { %v2491_v3 = vmul.f32 -1.442695, %v4650_v0  ;;  %v3150_v14 = vpop.eup %3149  ;;  %3163 = vpow2.f32 %v2488_v55  ;;  %v4655_v47 = vadd.f32 %v2114_v13, %v2018_v23  ;;  %v2637_v2 = vpop.f32.mrf.mxu1 }
 0x401   :  { %v2718_v30 = vpop.f32.mrf.mxu0  ;;  %3165 = vrcp.f32 %v2192_v31  ;;  %v2191_v34 = vadd.f32 1.0, %v3150_v14  ;;  %v2039_v1 = vadd.f32 %v2636_v25, %v4608_v20 }
 0x402   :  { %v3152_v32 = vpop.eup %3151  ;;  %3167 = vpow2.f32 %v2491_v3  ;;  %v2489_v37 = vmul.f32 -1.442695, %v4655_v47  ;;  %v2638_v33 = vpop.f32.mrf.mxu1 }
 0x403   :  { %v2127_v18 = vpop.f32.mrf.mxu0  ;;  %3169 = vrcp.f32 %v2191_v34  ;;  %v4660_v46 = vadd.f32 %v2718_v30, %v2039_v1  ;;  %v2639_v62 = vadd.f32 %v2638_v33, %v2637_v2  ;;  %v2196_v27 = vadd.f32 1.0, %v3152_v32 }
 0x404   :  { %v3154_v38 = vpop.eup %3153  ;;  %3171 = vpow2.f32 %v2489_v37  ;;  %v4662_v16 = vadd.f32 %v2127_v18, %v2031_v53 }
 0x405   :  { %v2719_v29 = vpop.f32.mrf.mxu0  ;;  %v2194_v48 = vadd.f32 1.0, %v3154_v38  ;;  %v2494_v28 = vmul.f32 -1.442695, %v4660_v46  ;;  %v2042_v59 = vadd.f32 %v2639_v62, %v4608_v20  ;;  %3173 = vrcp.f32 %v2193_v9 }
 0x406   :  { %v2492_v21 = vmul.f32 -1.442695, %v4662_v16  ;;  %v3156_v40 = vpop.eup %3155 }
 0x407   :  { %v2130_v45 = vpop.f32.mrf.mxu0  ;;  %3175 = vrcp.f32 %v2194_v48  ;;  %v4668_v57 = vadd.f32 %v2719_v29, %v2042_v59  ;;  %v2197_v42 = vadd.f32 1.0, %v3156_v40 }
 0x408   :  { %v4670_v35 = vadd.f32 %v2130_v45, %v2034_v12  ;;  %v3158_v61 = vpop.eup %3157  ;;  %3177 = vrcp.f32 %v2196_v27  ;;  %v3207_v27 = vld [vmem:[%s4773_s0] sm:$0xff] }
 0x409   :  { %v2195_v4 = vadd.f32 1.0, %v3158_v61  ;;  %3179 = vpow2.f32 %v2494_v28  ;;  %v2495_v15 = vmul.f32 -1.442695, %v4668_v57 }
 0x40a   :  { %v2493_v51 = vmul.f32 -1.442695, %v4670_v35  ;;  %3181 = vpow2.f32 %v2492_v21  ;;  %v3160_v20 = vpop.eup %3159  ;;  %v3208_v21 = vld [vmem:[%s4773_s0 + $0x8] sm:$0xff] }
 0x40b   :  { %3183 = vrcp.f32 %v2195_v4  ;;  %v2200_v60 = vadd.f32 1.0, %v3160_v20  ;;  %v3211_v20 = vld [vmem:[%s4773_s0 + $0x20] sm:$0xff] }
 0x40c   :  { %v3162_v52 = vpop.eup %3161  ;;  %3185 = vpow2.f32 %v2495_v15  ;;  %v3210_v15 = vld [vmem:[%s4773_s0 + $0x18] sm:$0xff] }
 0x40d   :  { %v3164_v17 = vpop.eup %3163  ;;  %3187 = vpow2.f32 %v2493_v51  ;;  %2254 = vrot.lane.b32.xlu0 %v3162_v52, %s3248_s4 }
 0x40e   :  { %v3166_v26 = vpop.eup %3165  ;;  %v2198_v39 = vadd.f32 1.0, %v3164_v17  ;;  %3189 = vrcp.f32 %v2197_v42 }
 0x40f   :  { %v3168_v54 = vpop.eup %3167 }
 0x410   :  { %v3170_v43 = vpop.eup %3169  ;;  %3191 = vrcp.f32 %v2198_v39  ;;  %v2201_v41 = vadd.f32 1.0, %v3168_v54  ;;  %v3213_v54 = vld [vmem:[%s4773_s0 + $0x30] sm:$0xff] }
 0x411   :  { %v3172_v8 = vpop.eup %3171  ;;  %2256 = vrot.lane.b32.xlu1 %v3170_v43, %s3248_s4  ;;  %2258 = vrot.lane.b32.xlu0 %v3166_v26, %s3248_s4  ;;  %3193 = vrcp.f32 %v2200_v60  ;;  %v3212_v26 = vld [vmem:[%s4773_s0 + $0x28] sm:$0xff] }
 0x412   :  { %v2199_v11 = vadd.f32 1.0, %v3172_v8  ;;  %v3174_v31 = vpop.eup %3173 }
 0x414   :  { %v3176_v44 = vpop.eup %3175  ;;  %3195 = vrcp.f32 %v2199_v11  ;;  %v3214_v11 = vld [vmem:[%s4773_s0 + $0x38] sm:$0xff] }
 0x415   :  { %v3178_v55 = vpop.eup %3177  ;;  %2260 = vrot.lane.b32.xlu1 %v3174_v31, %s3248_s4  ;;  %2262 = vrot.lane.b32.xlu0 %v3176_v44, %s3248_s4  ;;  %3197 = vrcp.f32 %v2201_v41  ;;  %v3215_v44 = vld [vmem:[%s4773_s0 + $0x40] sm:$0xff] }
 0x416   :  { %v3180_v56 = vpop.eup %3179 }
 0x417   :  { %v3182_v23 = vpop.eup %3181  ;;  %v2204_v14 = vadd.f32 1.0, %v3180_v56 }
 0x418   :  { %v3184_v13 = vpop.eup %3183  ;;  %v2202_v49 = vadd.f32 1.0, %v3182_v23  ;;  %v3216_v23 = vld [vmem:[%s4773_s0 + $0x48] sm:$0xff] }
 0x419   :  { %v3186_v3 = vpop.eup %3185  ;;  %2264 = vrot.lane.b32.xlu1 %v3184_v13, %s3248_s4  ;;  %2266 = vrot.lane.b32.xlu0 %v3178_v55, %s3248_s4 }
 0x41a   :  { %v3188_v25 = vpop.eup %3187  ;;  %3199 = vrcp.f32 %v2202_v49  ;;  %v2205_v22 = vadd.f32 1.0, %v3186_v3  ;;  %v3217_v49 = vld [vmem:[%s4773_s0 + $0x50] sm:$0xff] }
 0x41b   :  { %v2203_v2 = vadd.f32 1.0, %v3188_v25  ;;  %v3190_v30 = vpop.eup %3189 }
 0x41d   :  { %v3192_v34 = vpop.eup %3191  ;;  %3201 = vrcp.f32 %v2203_v2  ;;  %2268 = vrot.lane.b32.xlu1 %v3190_v30, %s3248_s4 }
 0x41e   :  { %3203 = vrcp.f32 %v2204_v14  ;;  %2270 = vrot.lane.b32.xlu0 %v3192_v34, %s3248_s4  ;;  %v3194_v1 = vpop.eup %3193  ;;  %v3219_v34 = vld [vmem:[%s4773_s0 + $0x60] sm:$0xff] }
 0x41f   :  { %3205 = vrcp.f32 %v2205_v22 }
 0x421   :  { %v3196_v32 = vpop.eup %3195 }
 0x422   :  { %2272 = vrot.lane.b32.xlu1 %v3196_v32, %s3248_s4  ;;  %2274 = vrot.lane.b32.xlu0 %v3194_v1, %s3248_s4  ;;  %v3198_v9 = vpop.eup %3197 }
 0x426   :  { %2276 = vrot.lane.b32.xlu1 %v3198_v9, %s3248_s4 }
 0x427   :  { %v3200_v37 = vpop.eup %3199 }
 0x428   :  { %2278 = vrot.lane.b32.xlu0 %v3200_v37, %s3248_s4  ;;  %v3220_v37 = vld [vmem:[%s4773_s0 + $0x68] sm:$0xff] }
 0x42a   :  { %v3202_v33 = vpop.eup %3201 }
 0x42b   :  { %v3204_v53 = vpop.eup %3203  ;;  %2280 = vrot.lane.b32.xlu1 %v3202_v33, %s3248_s4  ;;  %v3221_v33 = vld [vmem:[%s4773_s0 + $0x70] sm:$0xff] }
 0x42c   :  { %2282 = vrot.lane.b32.xlu0 %v3204_v53, %s3248_s4  ;;  %v3206_v18 = vpop.eup %3205 }
 0x42f   :  { %2284 = vrot.lane.b32.xlu1 %v3206_v18, %s3248_s4 }
 0x47f   :  { %v2255_v62 = vpop.permute.xlu0 %2254 }
 0x480   :  { %v2302_v38 = vmul.f32 %v2255_v62, %v4615_v36  ;;  %v3209_v36 = vld [vmem:[%s4773_s0 + $0x10] sm:$0xff] }
 0x482   :  { %v2318_v29 = vadd.f32 %v3207_v27, %v2302_v38 }
 0x483   :  { %v2257_v48 = vpop.permute.xlu1 %2256  ;;  %v2259_v28 = vpop.permute.xlu0 %2258 }
 0x484   :  { %2334 = vst.msk [vmem:[#allocation4] sm:$0xff] %vm262_vm6, %v2318_v29  ;;  %v2303_v59 = vmul.f32 %v2257_v48, %v4624_v7  ;;  %v2304_v12 = vmul.f32 %v2259_v28, %v4611_v24 }
 0x486   :  { %v2319_v45 = vadd.f32 %v3208_v21, %v2303_v59  ;;  %v2320_v40 = vadd.f32 %v3209_v36, %v2304_v12 }
 0x487   :  { %v2261_v61 = vpop.permute.xlu1 %2260  ;;  %v2263_v4 = vpop.permute.xlu0 %2262 }
 0x488   :  { %2335 = vst.msk [vmem:[#allocation4 + $0x8] sm:$0xff] %vm262_vm6, %v2319_v45  ;;  %2336 = vst.msk [vmem:[#allocation4 + $0x10] sm:$0xff] %vm262_vm6, %v2320_v40  ;;  %v2305_v7 = vmul.f32 %v2261_v61, %v4620_v10  ;;  %v2306_v24 = vmul.f32 %v2263_v4, %v4631_v58 }
 0x48a   :  { %v2321_v51 = vadd.f32 %v3210_v15, %v2305_v7  ;;  %v2322_v42 = vadd.f32 %v3211_v20, %v2306_v24 }
 0x48b   :  { %v2265_v52 = vpop.permute.xlu1 %2264  ;;  %v2267_v17 = vpop.permute.xlu0 %2266 }
 0x48c   :  { %2337 = vst.msk [vmem:[#allocation4 + $0x18] sm:$0xff] %vm262_vm6, %v2321_v51  ;;  %2338 = vst.msk [vmem:[#allocation4 + $0x20] sm:$0xff] %vm262_vm6, %v2322_v42  ;;  %v2307_v10 = vmul.f32 %v2265_v52, %v4640_v19  ;;  %v2308_v58 = vmul.f32 %v2267_v17, %v4627_v63 }
 0x48e   :  { %v2323_v39 = vadd.f32 %v3212_v26, %v2307_v10  ;;  %v2324_v60 = vadd.f32 %v3213_v54, %v2308_v58 }
 0x48f   :  { %v2269_v43 = vpop.permute.xlu1 %2268 }
 0x490   :  { %2339 = vst.msk [vmem:[#allocation4 + $0x28] sm:$0xff] %vm262_vm6, %v2323_v39  ;;  %2340 = vst.msk [vmem:[#allocation4 + $0x30] sm:$0xff] %vm262_vm6, %v2324_v60  ;;  %v2309_v8 = vmul.f32 %v2269_v43, %v4635_v6  ;;  %v2271_v19 = vpop.permute.xlu0 %2270 }
 0x491   :  { %v2310_v63 = vmul.f32 %v2271_v19, %v4648_v5 }
 0x492   :  { %v2325_v31 = vadd.f32 %v3214_v11, %v2309_v8 }
 0x493   :  { %v2326_v41 = vadd.f32 %v3215_v44, %v2310_v63 }
 0x494   :  { %2341 = vst.msk [vmem:[#allocation4 + $0x38] sm:$0xff] %vm262_vm6, %v2325_v31  ;;  %v2273_v55 = vpop.permute.xlu1 %2272  ;;  %v2275_v56 = vpop.permute.xlu0 %2274 }
 0x495   :  { %2342 = vst.msk [vmem:[#allocation4 + $0x40] sm:$0xff] %vm262_vm6, %v2326_v41  ;;  %v2311_v6 = vmul.f32 %v2273_v55, %v4655_v47  ;;  %v2312_v5 = vmul.f32 %v2275_v56, %v4643_v50  ;;  %v3218_v50 = vld [vmem:[%s4773_s0 + $0x58] sm:$0xff] }
 0x497   :  { %v2327_v13 = vadd.f32 %v3216_v23, %v2311_v6  ;;  %v2328_v3 = vadd.f32 %v3217_v49, %v2312_v5 }
 0x498   :  { %v2277_v25 = vpop.permute.xlu1 %2276 }
 0x499   :  { %2343 = vst.msk [vmem:[#allocation4 + $0x48] sm:$0xff] %vm262_vm6, %v2327_v13  ;;  %2344 = vst.msk [vmem:[#allocation4 + $0x50] sm:$0xff] %vm262_vm6, %v2328_v3  ;;  %v2313_v14 = vmul.f32 %v2277_v25, %v4650_v0 }
 0x49a   :  { %v2279_v47 = vpop.permute.xlu0 %2278 }
 0x49b   :  { %v2329_v2 = vadd.f32 %v3218_v50, %v2313_v14  ;;  %v2314_v30 = vmul.f32 %v2279_v47, %v4662_v16 }
 0x49d   :  { %2345 = vst.msk [vmem:[#allocation4 + $0x58] sm:$0xff] %vm262_vm6, %v2329_v2  ;;  %v2330_v22 = vadd.f32 %v3219_v34, %v2314_v30  ;;  %v2281_v1 = vpop.permute.xlu1 %2280 }
 0x49e   :  { %v2315_v32 = vmul.f32 %v2281_v1, %v4670_v35  ;;  %v2283_v9 = vpop.permute.xlu0 %2282 }
 0x49f   :  { %2346 = vst.msk [vmem:[#allocation4 + $0x60] sm:$0xff] %vm262_vm6, %v2330_v22  ;;  %v2316_v0 = vmul.f32 %v2283_v9, %v4660_v46  ;;  %v3222_v46 = vld [vmem:[%s4773_s0 + $0x78] sm:$0xff] }
 0x4a0   :  { %v2331_v16 = vadd.f32 %v3220_v37, %v2315_v32 }
 0x4a1   :  { %v2332_v53 = vadd.f32 %v3221_v33, %v2316_v0  ;;  %v2285_v18 = vpop.permute.xlu1 %2284 }
 0x4a2   :  { %2347 = vst.msk [vmem:[#allocation4 + $0x68] sm:$0xff] %vm262_vm6, %v2331_v16  ;;  %v2317_v35 = vmul.f32 %v2285_v18, %v4668_v57 }
 0x4a3   :  { %2348 = vst.msk [vmem:[#allocation4 + $0x70] sm:$0xff] %vm262_vm6, %v2332_v53 }
 0x4a4   :  { %v2333_v62 = vadd.f32 %v3222_v46, %v2317_v35 }
 0x4a6   :  { %2349 = vst.msk [vmem:[#allocation4 + $0x78] sm:$0xff] %vm262_vm6, %v2333_v62 }
 0x4a7   :  { %3234 = shalt.err (!%p3231_p4)
}
 0x4a8   :  { %s3250_s29 = smov 128   ;;  %s3251_s30 = smov 8  }
 0x4a9   :  { %2361 = dma.vmem_to_hbm [thread:$0]  %s2356_s26, 2048, %s4778_s5, [#allocation5], %s3250_s29, %s3250_s29, %s3251_s30  }
 0x4aa   :  { %3243 = dma.done.wait [#allocation5], 2048  }
 0x4ab   :  { %3244 = vsyncadd [#allocation5], 4294965248 }
 0x4ac   :  { %2365 = vsyncpa [#allocation5], 1 }

</bundles_post_ra>
